<compile_context>
chip_gen: v5e
topology: v5e:2x2
jax: 0.10.0
libtpu: 0.0.40
codegen_flags: <defaults>
</compile_context>

<pallas_src>
import jax
import jax.numpy as jnp
from jax.experimental import pallas as pl
from jax.experimental.pallas import tpu as pltpu


def _round_up(x, m):
    return ((x + m - 1) // m) * m


# ----------------------------------------------------------------------------
# Fused kernel: embedding gather + ReLU + GRU cell + vocab-tiled output Linear.
# ----------------------------------------------------------------------------
def decoder_step_kernel(ids_ref, emb_hbm, h0_ref, wih_ref, whh_ref,
                        bih_ref, bhh_ref, wout_ref, bout_ref,
                        logits_ref, hnew_ref, xbuf, hbf, sem):
    B, H = hnew_ref.shape
    j = pl.program_id(0)

    @pl.when(j == 0)
    def _gru_step():
        # Kick off the B row gathers from the HBM embedding table.
        copies = []
        for b in range(B):                               # B is small & static
            cp = pltpu.make_async_copy(
                emb_hbm.at[pl.ds(ids_ref[b], 1)],        # (1, H) row, dyn index
                xbuf.at[pl.ds(b, 1)],
                sem.at[b])
            cp.start()
            copies.append(cp)

        # Hide the gather latency behind the hidden-side matmul.
        h = h0_ref[...]                                  # (B, H) f32
        h_b = h.astype(jnp.bfloat16)
        gh = jnp.dot(h_b, whh_ref[...],
                     preferred_element_type=jnp.float32) + bhh_ref[...]

        for cp in copies:
            cp.wait()

        # relu(embedding(input)); bf16 MXU operand, f32 accumulation.
        x = jnp.maximum(xbuf[...], 0.0)
        gi = jnp.dot(x.astype(jnp.bfloat16), wih_ref[...],
                     preferred_element_type=jnp.float32) + bih_ref[...]

        # PyTorch GRU gate order [r, z, n]; gate math in f32.
        i_r, i_z, i_n = gi[:, 0:H], gi[:, H:2 * H], gi[:, 2 * H:3 * H]
        h_r, h_z, h_n = gh[:, 0:H], gh[:, H:2 * H], gh[:, 2 * H:3 * H]
        r = jax.nn.sigmoid(i_r + h_r)
        z = jax.nn.sigmoid(i_z + h_z)
        n = jnp.tanh(i_n + r * h_n)
        h_new = (1.0 - z) * n + z * h

        hnew_ref[...] = h_new                            # f32 hidden out
        hbf[...] = h_new.astype(jnp.bfloat16)            # MXU operand for Linear

    # Output Linear on the current vocab tile (every grid step; h from scratch).
    logits_ref[...] = (jnp.dot(hbf[...], wout_ref[...],
                               preferred_element_type=jnp.float32)
                       + bout_ref[...])


# ----------------------------------------------------------------------------
# VMEM footprint / vocab-tile selection.
# ----------------------------------------------------------------------------
def _footprint_bytes(B, H, tv):
    fixed = (2 * (H * 3 * H) * 2       # W_ih, W_hh (bf16, resident)
             + 2 * (3 * H) * 4         # b_ih, b_hh (f32)
             + 2 * B * H * 4           # h0 in + h_new out (f32)
             + B * H * 4               # xbuf scratch (f32)
             + B * H * 2)              # hbf scratch (bf16)
    per_tile = H * tv * 2 + tv * 4 + B * tv * 4   # W_out tile + b_out + logits
    return fixed + 2 * per_tile        # grid-varying blocks are double-buffered


def _pick_tile_v(V_pad, B, H, budget):
    """Largest 128-multiple divisor of V_pad whose footprint fits the budget."""
    tv = V_pad
    while tv > 128:
        if V_pad % tv == 0 and _footprint_bytes(B, H, tv) + (2 << 20) <= budget:
            return tv
        tv -= 128
    return 128


# ----------------------------------------------------------------------------
# Wrapper (matches DecoderRNN.forward semantics).
# ----------------------------------------------------------------------------
def decoder_rnn_forward(input_ids, hidden, params):
    """input_ids: (B,) int; hidden: (1, B, H) f32.
    Returns (logits (B, V) f32, hidden (1, B, H) f32)."""
    emb = params["embedding"]                  # (V, H) f32, row 0 zeroed
    V = params["output_size"]
    B = input_ids.shape[0]
    H = emb.shape[1]
    V_pad = params["w_out_t"].shape[1]
    assert H % 128 == 0, "hidden_size must be a multiple of 128"

    # Pad batch to a sublane multiple so every vector store is unmasked.
    B_pad = max(8, _round_up(B, 8))
    ids = jnp.zeros((B_pad,), jnp.int32).at[:B].set(input_ids.astype(jnp.int32))
    h0 = jnp.zeros((B_pad, H), jnp.float32).at[:B].set(hidden.reshape(B, H))

    # Vocab tile sized to this chip's VMEM (no artificial 64 MiB clamp).
    try:
        vmem_cap = int(pltpu.get_tpu_info().vmem_capacity_bytes)
    except Exception:
        vmem_cap = 64 << 20                    # v7x per-TC size: safe lower bound
    budget = (vmem_cap * 3) // 4               # headroom for Mosaic internals
    tv = _pick_tile_v(V_pad, B_pad, H, budget)
    nv = V_pad // tv
    vmem_limit = min(max(_footprint_bytes(B_pad, H, tv) + (2 << 20), 16 << 20),
                     budget)

    grid_spec = pltpu.PrefetchScalarGridSpec(
        num_scalar_prefetch=1,                 # token ids -> SMEM
        grid=(nv,),
        in_specs=[
            pl.BlockSpec(memory_space=pl.ANY),                    # embedding (HBM)
            pl.BlockSpec((B_pad, H), lambda j, _ids: (0, 0)),     # h0 (resident)
            pl.BlockSpec((H, 3 * H), lambda j, _ids: (0, 0)),     # W_ih^T
            pl.BlockSpec((H, 3 * H), lambda j, _ids: (0, 0)),     # W_hh^T
            pl.BlockSpec((1, 3 * H), lambda j, _ids: (0, 0)),     # b_ih
            pl.BlockSpec((1, 3 * H), lambda j, _ids: (0, 0)),     # b_hh
            pl.BlockSpec((H, tv), lambda j, _ids: (0, j)),        # W_out^T tile
            pl.BlockSpec((1, tv), lambda j, _ids: (0, j)),        # b_out tile
        ],
        out_specs=[
            pl.BlockSpec((B_pad, tv), lambda j, _ids: (0, j)),    # logits tile
            pl.BlockSpec((B_pad, H), lambda j, _ids: (0, 0)),     # h_new
        ],
        scratch_shapes=[
            pltpu.VMEM((B_pad, H), jnp.float32),                  # gathered embeddings
            pltpu.VMEM((B_pad, H), jnp.bfloat16),                 # h_new bf16 operand
            pltpu.SemaphoreType.DMA((B_pad,)),
        ],
    )

    logits_pad, h_new = pl.pallas_call(
        decoder_step_kernel,
        out_shape=(jax.ShapeDtypeStruct((B_pad, V_pad), jnp.float32),
                   jax.ShapeDtypeStruct((B_pad, H), jnp.float32)),
        grid_spec=grid_spec,
        compiler_params=pltpu.CompilerParams(
            # Later vocab tiles reuse the hidden state computed at j == 0 (VMEM
            # scratch), so the vocab axis must run sequentially on one core.
            dimension_semantics=("arbitrary",),
            vmem_limit_bytes=int(vmem_limit)),
    )(ids, emb, h0,
      params["w_ih_t"], params["w_hh_t"], params["b_ih"], params["b_hh"],
      params["w_out_t"], params["b_out"])

    logits = logits_pad[:B, :V]
    return logits, h_new[:B].reshape(1, B, H)


# ----------------------------------------------------------------------------
# Parameter setup mirroring DecoderRNN.__init__ (done ONCE, not per step).
# ----------------------------------------------------------------------------
def init_params(key, hidden_size, output_size):
    H, V = hidden_size, output_size
    assert H % 128 == 0
    V_pad = _round_up(V, 128)
    ks = jax.random.split(key, 7)
    bound = 1.0 / jnp.sqrt(jnp.float32(H))

    def u(k, shape):
        return jax.random.uniform(k, shape, jnp.float32, -bound, bound)

    emb = jax.random.normal(ks[0], (V, H), jnp.float32)
    emb = emb.at[0].set(0.0)                     # padding_idx=0 -> zero row

    w_out = u(ks[5], (V, H))                     # nn.Linear.weight layout (V, H)
    b_out = u(ks[6], (V,))
    w_out_t = jnp.zeros((H, V_pad), jnp.float32).at[:, :V].set(w_out.T)
    b_out_p = jnp.zeros((1, V_pad), jnp.float32).at[:, :V].set(b_out[None, :])

    return {
        "output_size": V,
        "embedding": emb,                                        # (V, H) f32
        "w_ih_t": u(ks[1], (3 * H, H)).T.astype(jnp.bfloat16),   # (H, 3H)
        "w_hh_t": u(ks[2], (3 * H, H)).T.astype(jnp.bfloat16),   # (H, 3H)
        "b_ih": u(ks[3], (3 * H,)).reshape(1, 3 * H),            # (1, 3H) f32
        "b_hh": u(ks[4], (3 * H,)).reshape(1, 3 * H),            # (1, 3H) f32
        "w_out_t": w_out_t.astype(jnp.bfloat16),                 # (H, V_pad)
        "b_out": b_out_p,                                        # (1, V_pad) f32
    }


# ----------------------------------------------------------------------------
# Pure-JAX reference (mirrors the kernel's bf16 operand rounding).
# ----------------------------------------------------------------------------
def reference_forward(input_ids, hidden, params):
    V = params["output_size"]
    H = params["embedding"].shape[1]
    B = input_ids.shape[0]
    f32 = jnp.float32
    x = jnp.maximum(params["embedding"][input_ids], 0.0)                  # (B, H)
    xb = x.astype(jnp.bfloat16).astype(f32)
    h = hidden.reshape(B, H)
    hb = h.astype(jnp.bfloat16).astype(f32)
    gi = xb @ params["w_ih_t"].astype(f32) + params["b_ih"]
    gh = hb @ params["w_hh_t"].astype(f32) + params["b_hh"]
    i_r, i_z, i_n = gi[:, :H], gi[:, H:2 * H], gi[:, 2 * H:]
    h_r, h_z, h_n = gh[:, :H], gh[:, H:2 * H], gh[:, 2 * H:]
    r = jax.nn.sigmoid(i_r + h_r)
    z = jax.nn.sigmoid(i_z + h_z)
    n = jnp.tanh(i_n + r * h_n)
    h_new = (1.0 - z) * n + z * h
    hb_new = h_new.astype(jnp.bfloat16).astype(f32)
    logits = hb_new @ params["w_out_t"].astype(f32) + params["b_out"]
    return logits[:, :V], h_new.reshape(1, B, H)


if __name__ == "__main__":
    BATCH = 10       # BATCH_SIZE in the reference module
    HIDDEN = 128     # hidden_size in the reference module
    VOCAB = 1000     # output_size (not a 128-multiple -> exercises vocab padding)

    key = jax.random.PRNGKey(0)
    k_par, k_ids, k_hid = jax.random.split(key, 3)

    params = init_params(k_par, HIDDEN, VOCAB)
    input_ids = jax.random.randint(k_ids, (BATCH,), 0, VOCAB, jnp.int32)
    input_ids = input_ids.at[0].set(0)           # exercise padding_idx=0
    hidden = jax.random.uniform(k_hid, (1, BATCH, HIDDEN), jnp.float32)

    fwd = jax.jit(lambda ids, h: decoder_rnn_forward(ids, h, params))
    logits, h_new = fwd(input_ids, hidden)
    jax.block_until_ready((logits, h_new))

    assert logits.shape == (BATCH, VOCAB)
    assert h_new.shape == (1, BATCH, HIDDEN)

    ref_logits, ref_h = reference_forward(input_ids, hidden, params)
    assert jnp.allclose(logits, ref_logits, atol=2e-2, rtol=2e-2), \
        f"logits max err {float(jnp.max(jnp.abs(logits - ref_logits)))}"
    assert jnp.allclose(h_new, ref_h, atol=2e-2, rtol=2e-2), \
        f"hidden max err {float(jnp.max(jnp.abs(h_new - ref_h)))}"
    print("KERNEL_OK")
</pallas_src>

<mosaic_0001>
module attributes {stable_mosaic.version = 11 : i64} {
  func.func @decoder_step_kernel(%arg0: i32, %arg1: memref<16xi32, #tpu.memory_space<smem>>, %arg2: memref<1000x128xf32, #tpu.memory_space<any>>, %arg3: memref<16x128xf32, #tpu.memory_space<vmem>>, %arg4: memref<128x384xbf16, #tpu.memory_space<vmem>>, %arg5: memref<128x384xbf16, #tpu.memory_space<vmem>>, %arg6: memref<1x384xf32, #tpu.memory_space<vmem>>, %arg7: memref<1x384xf32, #tpu.memory_space<vmem>>, %arg8: memref<128x1024xbf16, #tpu.memory_space<vmem>>, %arg9: memref<1x1024xf32, #tpu.memory_space<vmem>>, %arg10: memref<16x1024xf32, #tpu.memory_space<vmem>>, %arg11: memref<16x128xf32, #tpu.memory_space<vmem>>, %arg12: memref<16x128xf32, #tpu.memory_space<vmem>>, %arg13: memref<16x128xbf16, #tpu.memory_space<vmem>>, %arg14: memref<16x!tpu.dma_semaphore, #tpu.memory_space<semaphore_mem>>) attributes {dimension_semantics = [#tpu.dimension_semantics<arbitrary>], iteration_bounds = array<i64: 1>, scalar_prefetch = 1 : i64, scratch_operands = 3 : i64, tpu.core_type = #tpu.core_type<tc>, window_params = [{}, {pipeline_mode = #tpu.pipeline_mode<synchronous>, transform_indices = @transform_1, window_bounds = array<i64: 16, 128>}, {pipeline_mode = #tpu.pipeline_mode<synchronous>, transform_indices = @transform_2, window_bounds = array<i64: 128, 384>}, {pipeline_mode = #tpu.pipeline_mode<synchronous>, transform_indices = @transform_3, window_bounds = array<i64: 128, 384>}, {pipeline_mode = #tpu.pipeline_mode<synchronous>, transform_indices = @transform_4, window_bounds = array<i64: 1, 384>}, {pipeline_mode = #tpu.pipeline_mode<synchronous>, transform_indices = @transform_5, window_bounds = array<i64: 1, 384>}, {transform_indices = @transform_6, window_bounds = array<i64: 128, 1024>}, {transform_indices = @transform_7, window_bounds = array<i64: 1, 1024>}, {transform_indices = @transform_8, window_bounds = array<i64: 16, 1024>}, {pipeline_mode = #tpu.pipeline_mode<synchronous>, transform_indices = @transform_9, window_bounds = array<i64: 16, 128>}]} {
    %c0_i32 = arith.constant 0 : i32
    %0 = arith.cmpi eq, %arg0, %c0_i32 : i32
    %1 = arith.extui %0 : i1 to i32
    %c0_i32_0 = arith.constant 0 : i32
    %2 = arith.cmpi ne, %1, %c0_i32_0 : i32
    scf.if %2 {
      %c0_8 = arith.constant 0 : index
      %10 = memref.load %arg1[%c0_8] : memref<16xi32, #tpu.memory_space<smem>>
      %c0_i32_9 = arith.constant 0 : i32
      %c0_i32_10 = arith.constant 0 : i32
      %11 = tpu.memref_slice %arg2[%10, %c0_i32_10] : memref<1000x128xf32, #tpu.memory_space<any>> -> memref<1x128xf32, #tpu.memory_space<any>>
      %c0_i32_11 = arith.constant 0 : i32
      %c0_i32_12 = arith.constant 0 : i32
      %12 = tpu.memref_slice %arg12[%c0_i32_11, %c0_i32_12] : memref<16x128xf32, #tpu.memory_space<vmem>> -> memref<1x128xf32, #tpu.memory_space<vmem>>
      %13 = tpu.memref_slice %arg14[%c0_i32_9] : memref<16x!tpu.dma_semaphore, #tpu.memory_space<semaphore_mem>> -> memref<1x!tpu.dma_semaphore, #tpu.memory_space<semaphore_mem>>
      %14 = tpu.memref_squeeze %13 : memref<1x!tpu.dma_semaphore, #tpu.memory_space<semaphore_mem>> -> memref<!tpu.dma_semaphore, #tpu.memory_space<semaphore_mem>>
      tpu.enqueue_dma source(%11 : memref<1x128xf32, #tpu.memory_space<any>>) target(%12 : memref<1x128xf32, #tpu.memory_space<vmem>>) target_semaphore(%14 : memref<!tpu.dma_semaphore, #tpu.memory_space<semaphore_mem>>)
      %c1 = arith.constant 1 : index
      %15 = memref.load %arg1[%c1] : memref<16xi32, #tpu.memory_space<smem>>
      %c1_i32 = arith.constant 1 : i32
      %c0_i32_13 = arith.constant 0 : i32
      %16 = tpu.memref_slice %arg2[%15, %c0_i32_13] : memref<1000x128xf32, #tpu.memory_space<any>> -> memref<1x128xf32, #tpu.memory_space<any>>
      %c1_i32_14 = arith.constant 1 : i32
      %c0_i32_15 = arith.constant 0 : i32
      %17 = tpu.memref_slice %arg12[%c1_i32_14, %c0_i32_15] : memref<16x128xf32, #tpu.memory_space<vmem>> -> memref<1x128xf32, #tpu.memory_space<vmem>>
      %18 = tpu.memref_slice %arg14[%c1_i32] : memref<16x!tpu.dma_semaphore, #tpu.memory_space<semaphore_mem>> -> memref<1x!tpu.dma_semaphore, #tpu.memory_space<semaphore_mem>>
      %19 = tpu.memref_squeeze %18 : memref<1x!tpu.dma_semaphore, #tpu.memory_space<semaphore_mem>> -> memref<!tpu.dma_semaphore, #tpu.memory_space<semaphore_mem>>
      tpu.enqueue_dma source(%16 : memref<1x128xf32, #tpu.memory_space<any>>) target(%17 : memref<1x128xf32, #tpu.memory_space<vmem>>) target_semaphore(%19 : memref<!tpu.dma_semaphore, #tpu.memory_space<semaphore_mem>>)
      %c2 = arith.constant 2 : index
      %20 = memref.load %arg1[%c2] : memref<16xi32, #tpu.memory_space<smem>>
      %c2_i32 = arith.constant 2 : i32
      %c0_i32_16 = arith.constant 0 : i32
      %21 = tpu.memref_slice %arg2[%20, %c0_i32_16] : memref<1000x128xf32, #tpu.memory_space<any>> -> memref<1x128xf32, #tpu.memory_space<any>>
      %c2_i32_17 = arith.constant 2 : i32
      %c0_i32_18 = arith.constant 0 : i32
      %22 = tpu.memref_slice %arg12[%c2_i32_17, %c0_i32_18] : memref<16x128xf32, #tpu.memory_space<vmem>> -> memref<1x128xf32, #tpu.memory_space<vmem>>
      %23 = tpu.memref_slice %arg14[%c2_i32] : memref<16x!tpu.dma_semaphore, #tpu.memory_space<semaphore_mem>> -> memref<1x!tpu.dma_semaphore, #tpu.memory_space<semaphore_mem>>
      %24 = tpu.memref_squeeze %23 : memref<1x!tpu.dma_semaphore, #tpu.memory_space<semaphore_mem>> -> memref<!tpu.dma_semaphore, #tpu.memory_space<semaphore_mem>>
      tpu.enqueue_dma source(%21 : memref<1x128xf32, #tpu.memory_space<any>>) target(%22 : memref<1x128xf32, #tpu.memory_space<vmem>>) target_semaphore(%24 : memref<!tpu.dma_semaphore, #tpu.memory_space<semaphore_mem>>)
      %c3 = arith.constant 3 : index
      %25 = memref.load %arg1[%c3] : memref<16xi32, #tpu.memory_space<smem>>
      %c3_i32 = arith.constant 3 : i32
      %c0_i32_19 = arith.constant 0 : i32
      %26 = tpu.memref_slice %arg2[%25, %c0_i32_19] : memref<1000x128xf32, #tpu.memory_space<any>> -> memref<1x128xf32, #tpu.memory_space<any>>
      %c3_i32_20 = arith.constant 3 : i32
      %c0_i32_21 = arith.constant 0 : i32
      %27 = tpu.memref_slice %arg12[%c3_i32_20, %c0_i32_21] : memref<16x128xf32, #tpu.memory_space<vmem>> -> memref<1x128xf32, #tpu.memory_space<vmem>>
      %28 = tpu.memref_slice %arg14[%c3_i32] : memref<16x!tpu.dma_semaphore, #tpu.memory_space<semaphore_mem>> -> memref<1x!tpu.dma_semaphore, #tpu.memory_space<semaphore_mem>>
      %29 = tpu.memref_squeeze %28 : memref<1x!tpu.dma_semaphore, #tpu.memory_space<semaphore_mem>> -> memref<!tpu.dma_semaphore, #tpu.memory_space<semaphore_mem>>
      tpu.enqueue_dma source(%26 : memref<1x128xf32, #tpu.memory_space<any>>) target(%27 : memref<1x128xf32, #tpu.memory_space<vmem>>) target_semaphore(%29 : memref<!tpu.dma_semaphore, #tpu.memory_space<semaphore_mem>>)
      %c4 = arith.constant 4 : index
      %30 = memref.load %arg1[%c4] : memref<16xi32, #tpu.memory_space<smem>>
      %c4_i32 = arith.constant 4 : i32
      %c0_i32_22 = arith.constant 0 : i32
      %31 = tpu.memref_slice %arg2[%30, %c0_i32_22] : memref<1000x128xf32, #tpu.memory_space<any>> -> memref<1x128xf32, #tpu.memory_space<any>>
      %c4_i32_23 = arith.constant 4 : i32
      %c0_i32_24 = arith.constant 0 : i32
      %32 = tpu.memref_slice %arg12[%c4_i32_23, %c0_i32_24] : memref<16x128xf32, #tpu.memory_space<vmem>> -> memref<1x128xf32, #tpu.memory_space<vmem>>
      %33 = tpu.memref_slice %arg14[%c4_i32] : memref<16x!tpu.dma_semaphore, #tpu.memory_space<semaphore_mem>> -> memref<1x!tpu.dma_semaphore, #tpu.memory_space<semaphore_mem>>
      %34 = tpu.memref_squeeze %33 : memref<1x!tpu.dma_semaphore, #tpu.memory_space<semaphore_mem>> -> memref<!tpu.dma_semaphore, #tpu.memory_space<semaphore_mem>>
      tpu.enqueue_dma source(%31 : memref<1x128xf32, #tpu.memory_space<any>>) target(%32 : memref<1x128xf32, #tpu.memory_space<vmem>>) target_semaphore(%34 : memref<!tpu.dma_semaphore, #tpu.memory_space<semaphore_mem>>)
      %c5 = arith.constant 5 : index
      %35 = memref.load %arg1[%c5] : memref<16xi32, #tpu.memory_space<smem>>
      %c5_i32 = arith.constant 5 : i32
      %c0_i32_25 = arith.constant 0 : i32
      %36 = tpu.memref_slice %arg2[%35, %c0_i32_25] : memref<1000x128xf32, #tpu.memory_space<any>> -> memref<1x128xf32, #tpu.memory_space<any>>
      %c5_i32_26 = arith.constant 5 : i32
      %c0_i32_27 = arith.constant 0 : i32
      %37 = tpu.memref_slice %arg12[%c5_i32_26, %c0_i32_27] : memref<16x128xf32, #tpu.memory_space<vmem>> -> memref<1x128xf32, #tpu.memory_space<vmem>>
      %38 = tpu.memref_slice %arg14[%c5_i32] : memref<16x!tpu.dma_semaphore, #tpu.memory_space<semaphore_mem>> -> memref<1x!tpu.dma_semaphore, #tpu.memory_space<semaphore_mem>>
      %39 = tpu.memref_squeeze %38 : memref<1x!tpu.dma_semaphore, #tpu.memory_space<semaphore_mem>> -> memref<!tpu.dma_semaphore, #tpu.memory_space<semaphore_mem>>
      tpu.enqueue_dma source(%36 : memref<1x128xf32, #tpu.memory_space<any>>) target(%37 : memref<1x128xf32, #tpu.memory_space<vmem>>) target_semaphore(%39 : memref<!tpu.dma_semaphore, #tpu.memory_space<semaphore_mem>>)
      %c6 = arith.constant 6 : index
      %40 = memref.load %arg1[%c6] : memref<16xi32, #tpu.memory_space<smem>>
      %c6_i32 = arith.constant 6 : i32
      %c0_i32_28 = arith.constant 0 : i32
      %41 = tpu.memref_slice %arg2[%40, %c0_i32_28] : memref<1000x128xf32, #tpu.memory_space<any>> -> memref<1x128xf32, #tpu.memory_space<any>>
      %c6_i32_29 = arith.constant 6 : i32
      %c0_i32_30 = arith.constant 0 : i32
      %42 = tpu.memref_slice %arg12[%c6_i32_29, %c0_i32_30] : memref<16x128xf32, #tpu.memory_space<vmem>> -> memref<1x128xf32, #tpu.memory_space<vmem>>
      %43 = tpu.memref_slice %arg14[%c6_i32] : memref<16x!tpu.dma_semaphore, #tpu.memory_space<semaphore_mem>> -> memref<1x!tpu.dma_semaphore, #tpu.memory_space<semaphore_mem>>
      %44 = tpu.memref_squeeze %43 : memref<1x!tpu.dma_semaphore, #tpu.memory_space<semaphore_mem>> -> memref<!tpu.dma_semaphore, #tpu.memory_space<semaphore_mem>>
      tpu.enqueue_dma source(%41 : memref<1x128xf32, #tpu.memory_space<any>>) target(%42 : memref<1x128xf32, #tpu.memory_space<vmem>>) target_semaphore(%44 : memref<!tpu.dma_semaphore, #tpu.memory_space<semaphore_mem>>)
      %c7 = arith.constant 7 : index
      %45 = memref.load %arg1[%c7] : memref<16xi32, #tpu.memory_space<smem>>
      %c7_i32 = arith.constant 7 : i32
      %c0_i32_31 = arith.constant 0 : i32
      %46 = tpu.memref_slice %arg2[%45, %c0_i32_31] : memref<1000x128xf32, #tpu.memory_space<any>> -> memref<1x128xf32, #tpu.memory_space<any>>
      %c7_i32_32 = arith.constant 7 : i32
      %c0_i32_33 = arith.constant 0 : i32
      %47 = tpu.memref_slice %arg12[%c7_i32_32, %c0_i32_33] : memref<16x128xf32, #tpu.memory_space<vmem>> -> memref<1x128xf32, #tpu.memory_space<vmem>>
      %48 = tpu.memref_slice %arg14[%c7_i32] : memref<16x!tpu.dma_semaphore, #tpu.memory_space<semaphore_mem>> -> memref<1x!tpu.dma_semaphore, #tpu.memory_space<semaphore_mem>>
      %49 = tpu.memref_squeeze %48 : memref<1x!tpu.dma_semaphore, #tpu.memory_space<semaphore_mem>> -> memref<!tpu.dma_semaphore, #tpu.memory_space<semaphore_mem>>
      tpu.enqueue_dma source(%46 : memref<1x128xf32, #tpu.memory_space<any>>) target(%47 : memref<1x128xf32, #tpu.memory_space<vmem>>) target_semaphore(%49 : memref<!tpu.dma_semaphore, #tpu.memory_space<semaphore_mem>>)
      %c8 = arith.constant 8 : index
      %50 = memref.load %arg1[%c8] : memref<16xi32, #tpu.memory_space<smem>>
      %c8_i32 = arith.constant 8 : i32
      %c0_i32_34 = arith.constant 0 : i32
      %51 = tpu.memref_slice %arg2[%50, %c0_i32_34] : memref<1000x128xf32, #tpu.memory_space<any>> -> memref<1x128xf32, #tpu.memory_space<any>>
      %c8_i32_35 = arith.constant 8 : i32
      %c0_i32_36 = arith.constant 0 : i32
      %52 = tpu.memref_slice %arg12[%c8_i32_35, %c0_i32_36] : memref<16x128xf32, #tpu.memory_space<vmem>> -> memref<1x128xf32, #tpu.memory_space<vmem>>
      %53 = tpu.memref_slice %arg14[%c8_i32] : memref<16x!tpu.dma_semaphore, #tpu.memory_space<semaphore_mem>> -> memref<1x!tpu.dma_semaphore, #tpu.memory_space<semaphore_mem>>
      %54 = tpu.memref_squeeze %53 : memref<1x!tpu.dma_semaphore, #tpu.memory_space<semaphore_mem>> -> memref<!tpu.dma_semaphore, #tpu.memory_space<semaphore_mem>>
      tpu.enqueue_dma source(%51 : memref<1x128xf32, #tpu.memory_space<any>>) target(%52 : memref<1x128xf32, #tpu.memory_space<vmem>>) target_semaphore(%54 : memref<!tpu.dma_semaphore, #tpu.memory_space<semaphore_mem>>)
      %c9 = arith.constant 9 : index
      %55 = memref.load %arg1[%c9] : memref<16xi32, #tpu.memory_space<smem>>
      %c9_i32 = arith.constant 9 : i32
      %c0_i32_37 = arith.constant 0 : i32
      %56 = tpu.memref_slice %arg2[%55, %c0_i32_37] : memref<1000x128xf32, #tpu.memory_space<any>> -> memref<1x128xf32, #tpu.memory_space<any>>
      %c9_i32_38 = arith.constant 9 : i32
      %c0_i32_39 = arith.constant 0 : i32
      %57 = tpu.memref_slice %arg12[%c9_i32_38, %c0_i32_39] : memref<16x128xf32, #tpu.memory_space<vmem>> -> memref<1x128xf32, #tpu.memory_space<vmem>>
      %58 = tpu.memref_slice %arg14[%c9_i32] : memref<16x!tpu.dma_semaphore, #tpu.memory_space<semaphore_mem>> -> memref<1x!tpu.dma_semaphore, #tpu.memory_space<semaphore_mem>>
      %59 = tpu.memref_squeeze %58 : memref<1x!tpu.dma_semaphore, #tpu.memory_space<semaphore_mem>> -> memref<!tpu.dma_semaphore, #tpu.memory_space<semaphore_mem>>
      tpu.enqueue_dma source(%56 : memref<1x128xf32, #tpu.memory_space<any>>) target(%57 : memref<1x128xf32, #tpu.memory_space<vmem>>) target_semaphore(%59 : memref<!tpu.dma_semaphore, #tpu.memory_space<semaphore_mem>>)
      %c10 = arith.constant 10 : index
      %60 = memref.load %arg1[%c10] : memref<16xi32, #tpu.memory_space<smem>>
      %c10_i32 = arith.constant 10 : i32
      %c0_i32_40 = arith.constant 0 : i32
      %61 = tpu.memref_slice %arg2[%60, %c0_i32_40] : memref<1000x128xf32, #tpu.memory_space<any>> -> memref<1x128xf32, #tpu.memory_space<any>>
      %c10_i32_41 = arith.constant 10 : i32
      %c0_i32_42 = arith.constant 0 : i32
      %62 = tpu.memref_slice %arg12[%c10_i32_41, %c0_i32_42] : memref<16x128xf32, #tpu.memory_space<vmem>> -> memref<1x128xf32, #tpu.memory_space<vmem>>
      %63 = tpu.memref_slice %arg14[%c10_i32] : memref<16x!tpu.dma_semaphore, #tpu.memory_space<semaphore_mem>> -> memref<1x!tpu.dma_semaphore, #tpu.memory_space<semaphore_mem>>
      %64 = tpu.memref_squeeze %63 : memref<1x!tpu.dma_semaphore, #tpu.memory_space<semaphore_mem>> -> memref<!tpu.dma_semaphore, #tpu.memory_space<semaphore_mem>>
      tpu.enqueue_dma source(%61 : memref<1x128xf32, #tpu.memory_space<any>>) target(%62 : memref<1x128xf32, #tpu.memory_space<vmem>>) target_semaphore(%64 : memref<!tpu.dma_semaphore, #tpu.memory_space<semaphore_mem>>)
      %c11 = arith.constant 11 : index
      %65 = memref.load %arg1[%c11] : memref<16xi32, #tpu.memory_space<smem>>
      %c11_i32 = arith.constant 11 : i32
      %c0_i32_43 = arith.constant 0 : i32
      %66 = tpu.memref_slice %arg2[%65, %c0_i32_43] : memref<1000x128xf32, #tpu.memory_space<any>> -> memref<1x128xf32, #tpu.memory_space<any>>
      %c11_i32_44 = arith.constant 11 : i32
      %c0_i32_45 = arith.constant 0 : i32
      %67 = tpu.memref_slice %arg12[%c11_i32_44, %c0_i32_45] : memref<16x128xf32, #tpu.memory_space<vmem>> -> memref<1x128xf32, #tpu.memory_space<vmem>>
      %68 = tpu.memref_slice %arg14[%c11_i32] : memref<16x!tpu.dma_semaphore, #tpu.memory_space<semaphore_mem>> -> memref<1x!tpu.dma_semaphore, #tpu.memory_space<semaphore_mem>>
      %69 = tpu.memref_squeeze %68 : memref<1x!tpu.dma_semaphore, #tpu.memory_space<semaphore_mem>> -> memref<!tpu.dma_semaphore, #tpu.memory_space<semaphore_mem>>
      tpu.enqueue_dma source(%66 : memref<1x128xf32, #tpu.memory_space<any>>) target(%67 : memref<1x128xf32, #tpu.memory_space<vmem>>) target_semaphore(%69 : memref<!tpu.dma_semaphore, #tpu.memory_space<semaphore_mem>>)
      %c12 = arith.constant 12 : index
      %70 = memref.load %arg1[%c12] : memref<16xi32, #tpu.memory_space<smem>>
      %c12_i32 = arith.constant 12 : i32
      %c0_i32_46 = arith.constant 0 : i32
      %71 = tpu.memref_slice %arg2[%70, %c0_i32_46] : memref<1000x128xf32, #tpu.memory_space<any>> -> memref<1x128xf32, #tpu.memory_space<any>>
      %c12_i32_47 = arith.constant 12 : i32
      %c0_i32_48 = arith.constant 0 : i32
      %72 = tpu.memref_slice %arg12[%c12_i32_47, %c0_i32_48] : memref<16x128xf32, #tpu.memory_space<vmem>> -> memref<1x128xf32, #tpu.memory_space<vmem>>
      %73 = tpu.memref_slice %arg14[%c12_i32] : memref<16x!tpu.dma_semaphore, #tpu.memory_space<semaphore_mem>> -> memref<1x!tpu.dma_semaphore, #tpu.memory_space<semaphore_mem>>
      %74 = tpu.memref_squeeze %73 : memref<1x!tpu.dma_semaphore, #tpu.memory_space<semaphore_mem>> -> memref<!tpu.dma_semaphore, #tpu.memory_space<semaphore_mem>>
      tpu.enqueue_dma source(%71 : memref<1x128xf32, #tpu.memory_space<any>>) target(%72 : memref<1x128xf32, #tpu.memory_space<vmem>>) target_semaphore(%74 : memref<!tpu.dma_semaphore, #tpu.memory_space<semaphore_mem>>)
      %c13 = arith.constant 13 : index
      %75 = memref.load %arg1[%c13] : memref<16xi32, #tpu.memory_space<smem>>
      %c13_i32 = arith.constant 13 : i32
      %c0_i32_49 = arith.constant 0 : i32
      %76 = tpu.memref_slice %arg2[%75, %c0_i32_49] : memref<1000x128xf32, #tpu.memory_space<any>> -> memref<1x128xf32, #tpu.memory_space<any>>
      %c13_i32_50 = arith.constant 13 : i32
      %c0_i32_51 = arith.constant 0 : i32
      %77 = tpu.memref_slice %arg12[%c13_i32_50, %c0_i32_51] : memref<16x128xf32, #tpu.memory_space<vmem>> -> memref<1x128xf32, #tpu.memory_space<vmem>>
      %78 = tpu.memref_slice %arg14[%c13_i32] : memref<16x!tpu.dma_semaphore, #tpu.memory_space<semaphore_mem>> -> memref<1x!tpu.dma_semaphore, #tpu.memory_space<semaphore_mem>>
      %79 = tpu.memref_squeeze %78 : memref<1x!tpu.dma_semaphore, #tpu.memory_space<semaphore_mem>> -> memref<!tpu.dma_semaphore, #tpu.memory_space<semaphore_mem>>
      tpu.enqueue_dma source(%76 : memref<1x128xf32, #tpu.memory_space<any>>) target(%77 : memref<1x128xf32, #tpu.memory_space<vmem>>) target_semaphore(%79 : memref<!tpu.dma_semaphore, #tpu.memory_space<semaphore_mem>>)
      %c14 = arith.constant 14 : index
      %80 = memref.load %arg1[%c14] : memref<16xi32, #tpu.memory_space<smem>>
      %c14_i32 = arith.constant 14 : i32
      %c0_i32_52 = arith.constant 0 : i32
      %81 = tpu.memref_slice %arg2[%80, %c0_i32_52] : memref<1000x128xf32, #tpu.memory_space<any>> -> memref<1x128xf32, #tpu.memory_space<any>>
      %c14_i32_53 = arith.constant 14 : i32
      %c0_i32_54 = arith.constant 0 : i32
      %82 = tpu.memref_slice %arg12[%c14_i32_53, %c0_i32_54] : memref<16x128xf32, #tpu.memory_space<vmem>> -> memref<1x128xf32, #tpu.memory_space<vmem>>
      %83 = tpu.memref_slice %arg14[%c14_i32] : memref<16x!tpu.dma_semaphore, #tpu.memory_space<semaphore_mem>> -> memref<1x!tpu.dma_semaphore, #tpu.memory_space<semaphore_mem>>
      %84 = tpu.memref_squeeze %83 : memref<1x!tpu.dma_semaphore, #tpu.memory_space<semaphore_mem>> -> memref<!tpu.dma_semaphore, #tpu.memory_space<semaphore_mem>>
      tpu.enqueue_dma source(%81 : memref<1x128xf32, #tpu.memory_space<any>>) target(%82 : memref<1x128xf32, #tpu.memory_space<vmem>>) target_semaphore(%84 : memref<!tpu.dma_semaphore, #tpu.memory_space<semaphore_mem>>)
      %c15 = arith.constant 15 : index
      %85 = memref.load %arg1[%c15] : memref<16xi32, #tpu.memory_space<smem>>
      %c15_i32 = arith.constant 15 : i32
      %c0_i32_55 = arith.constant 0 : i32
      %86 = tpu.memref_slice %arg2[%85, %c0_i32_55] : memref<1000x128xf32, #tpu.memory_space<any>> -> memref<1x128xf32, #tpu.memory_space<any>>
      %c15_i32_56 = arith.constant 15 : i32
      %c0_i32_57 = arith.constant 0 : i32
      %87 = tpu.memref_slice %arg12[%c15_i32_56, %c0_i32_57] : memref<16x128xf32, #tpu.memory_space<vmem>> -> memref<1x128xf32, #tpu.memory_space<vmem>>
      %88 = tpu.memref_slice %arg14[%c15_i32] : memref<16x!tpu.dma_semaphore, #tpu.memory_space<semaphore_mem>> -> memref<1x!tpu.dma_semaphore, #tpu.memory_space<semaphore_mem>>
      %89 = tpu.memref_squeeze %88 : memref<1x!tpu.dma_semaphore, #tpu.memory_space<semaphore_mem>> -> memref<!tpu.dma_semaphore, #tpu.memory_space<semaphore_mem>>
      tpu.enqueue_dma source(%86 : memref<1x128xf32, #tpu.memory_space<any>>) target(%87 : memref<1x128xf32, #tpu.memory_space<vmem>>) target_semaphore(%89 : memref<!tpu.dma_semaphore, #tpu.memory_space<semaphore_mem>>)
      %c0_58 = arith.constant 0 : index
      %c0_59 = arith.constant 0 : index
      %90 = vector.load %arg3[%c0_58, %c0_59] : memref<16x128xf32, #tpu.memory_space<vmem>>, vector<16x128xf32>
      %91 = arith.truncf %90 : vector<16x128xf32> to vector<16x128xbf16>
      %c0_60 = arith.constant 0 : index
      %c0_61 = arith.constant 0 : index
      %92 = vector.load %arg5[%c0_60, %c0_61] : memref<128x384xbf16, #tpu.memory_space<vmem>>, vector<128x384xbf16>
      %cst_62 = arith.constant dense<0.000000e+00> : vector<16x384xf32>
      %93 = tpu.matmul %91, %92, %cst_62 {dimension_numbers = #tpu.dot_dimension_numbers<[1], [0], [0], [1], [0, 0, 1, 1], [], []>} : vector<16x128xbf16>, vector<128x384xbf16>, vector<16x384xf32> -> vector<16x384xf32>
      %c0_63 = arith.constant 0 : index
      %c0_64 = arith.constant 0 : index
      %94 = vector.load %arg7[%c0_63, %c0_64] : memref<1x384xf32, #tpu.memory_space<vmem>>, vector<1x384xf32>
      %95 = vector.broadcast %94 : vector<1x384xf32> to vector<16x384xf32>
      %96 = arith.addf %93, %95 : vector<16x384xf32>
      %c0_i32_65 = arith.constant 0 : i32
      %c0_i32_66 = arith.constant 0 : i32
      %97 = tpu.memref_slice %arg2[%10, %c0_i32_66] : memref<1000x128xf32, #tpu.memory_space<any>> -> memref<1x128xf32, #tpu.memory_space<any>>
      %c0_i32_67 = arith.constant 0 : i32
      %c0_i32_68 = arith.constant 0 : i32
      %98 = tpu.memref_slice %arg12[%c0_i32_67, %c0_i32_68] : memref<16x128xf32, #tpu.memory_space<vmem>> -> memref<1x128xf32, #tpu.memory_space<vmem>>
      %99 = tpu.memref_slice %arg14[%c0_i32_65] : memref<16x!tpu.dma_semaphore, #tpu.memory_space<semaphore_mem>> -> memref<1x!tpu.dma_semaphore, #tpu.memory_space<semaphore_mem>>
      %100 = tpu.memref_squeeze %99 : memref<1x!tpu.dma_semaphore, #tpu.memory_space<semaphore_mem>> -> memref<!tpu.dma_semaphore, #tpu.memory_space<semaphore_mem>>
      tpu.wait_dma2 semaphore(%100 : memref<!tpu.dma_semaphore, #tpu.memory_space<semaphore_mem>>) src(%97 : memref<1x128xf32, #tpu.memory_space<any>>) dst(%98 : memref<1x128xf32, #tpu.memory_space<vmem>>)
      %c1_i32_69 = arith.constant 1 : i32
      %c0_i32_70 = arith.constant 0 : i32
      %101 = tpu.memref_slice %arg2[%15, %c0_i32_70] : memref<1000x128xf32, #tpu.memory_space<any>> -> memref<1x128xf32, #tpu.memory_space<any>>
      %c1_i32_71 = arith.constant 1 : i32
      %c0_i32_72 = arith.constant 0 : i32
      %102 = tpu.memref_slice %arg12[%c1_i32_71, %c0_i32_72] : memref<16x128xf32, #tpu.memory_space<vmem>> -> memref<1x128xf32, #tpu.memory_space<vmem>>
      %103 = tpu.memref_slice %arg14[%c1_i32_69] : memref<16x!tpu.dma_semaphore, #tpu.memory_space<semaphore_mem>> -> memref<1x!tpu.dma_semaphore, #tpu.memory_space<semaphore_mem>>
      %104 = tpu.memref_squeeze %103 : memref<1x!tpu.dma_semaphore, #tpu.memory_space<semaphore_mem>> -> memref<!tpu.dma_semaphore, #tpu.memory_space<semaphore_mem>>
      tpu.wait_dma2 semaphore(%104 : memref<!tpu.dma_semaphore, #tpu.memory_space<semaphore_mem>>) src(%101 : memref<1x128xf32, #tpu.memory_space<any>>) dst(%102 : memref<1x128xf32, #tpu.memory_space<vmem>>)
      %c2_i32_73 = arith.constant 2 : i32
      %c0_i32_74 = arith.constant 0 : i32
      %105 = tpu.memref_slice %arg2[%20, %c0_i32_74] : memref<1000x128xf32, #tpu.memory_space<any>> -> memref<1x128xf32, #tpu.memory_space<any>>
      %c2_i32_75 = arith.constant 2 : i32
      %c0_i32_76 = arith.constant 0 : i32
      %106 = tpu.memref_slice %arg12[%c2_i32_75, %c0_i32_76] : memref<16x128xf32, #tpu.memory_space<vmem>> -> memref<1x128xf32, #tpu.memory_space<vmem>>
      %107 = tpu.memref_slice %arg14[%c2_i32_73] : memref<16x!tpu.dma_semaphore, #tpu.memory_space<semaphore_mem>> -> memref<1x!tpu.dma_semaphore, #tpu.memory_space<semaphore_mem>>
      %108 = tpu.memref_squeeze %107 : memref<1x!tpu.dma_semaphore, #tpu.memory_space<semaphore_mem>> -> memref<!tpu.dma_semaphore, #tpu.memory_space<semaphore_mem>>
      tpu.wait_dma2 semaphore(%108 : memref<!tpu.dma_semaphore, #tpu.memory_space<semaphore_mem>>) src(%105 : memref<1x128xf32, #tpu.memory_space<any>>) dst(%106 : memref<1x128xf32, #tpu.memory_space<vmem>>)
      %c3_i32_77 = arith.constant 3 : i32
      %c0_i32_78 = arith.constant 0 : i32
      %109 = tpu.memref_slice %arg2[%25, %c0_i32_78] : memref<1000x128xf32, #tpu.memory_space<any>> -> memref<1x128xf32, #tpu.memory_space<any>>
      %c3_i32_79 = arith.constant 3 : i32
      %c0_i32_80 = arith.constant 0 : i32
      %110 = tpu.memref_slice %arg12[%c3_i32_79, %c0_i32_80] : memref<16x128xf32, #tpu.memory_space<vmem>> -> memref<1x128xf32, #tpu.memory_space<vmem>>
      %111 = tpu.memref_slice %arg14[%c3_i32_77] : memref<16x!tpu.dma_semaphore, #tpu.memory_space<semaphore_mem>> -> memref<1x!tpu.dma_semaphore, #tpu.memory_space<semaphore_mem>>
      %112 = tpu.memref_squeeze %111 : memref<1x!tpu.dma_semaphore, #tpu.memory_space<semaphore_mem>> -> memref<!tpu.dma_semaphore, #tpu.memory_space<semaphore_mem>>
      tpu.wait_dma2 semaphore(%112 : memref<!tpu.dma_semaphore, #tpu.memory_space<semaphore_mem>>) src(%109 : memref<1x128xf32, #tpu.memory_space<any>>) dst(%110 : memref<1x128xf32, #tpu.memory_space<vmem>>)
      %c4_i32_81 = arith.constant 4 : i32
      %c0_i32_82 = arith.constant 0 : i32
      %113 = tpu.memref_slice %arg2[%30, %c0_i32_82] : memref<1000x128xf32, #tpu.memory_space<any>> -> memref<1x128xf32, #tpu.memory_space<any>>
      %c4_i32_83 = arith.constant 4 : i32
      %c0_i32_84 = arith.constant 0 : i32
      %114 = tpu.memref_slice %arg12[%c4_i32_83, %c0_i32_84] : memref<16x128xf32, #tpu.memory_space<vmem>> -> memref<1x128xf32, #tpu.memory_space<vmem>>
      %115 = tpu.memref_slice %arg14[%c4_i32_81] : memref<16x!tpu.dma_semaphore, #tpu.memory_space<semaphore_mem>> -> memref<1x!tpu.dma_semaphore, #tpu.memory_space<semaphore_mem>>
      %116 = tpu.memref_squeeze %115 : memref<1x!tpu.dma_semaphore, #tpu.memory_space<semaphore_mem>> -> memref<!tpu.dma_semaphore, #tpu.memory_space<semaphore_mem>>
      tpu.wait_dma2 semaphore(%116 : memref<!tpu.dma_semaphore, #tpu.memory_space<semaphore_mem>>) src(%113 : memref<1x128xf32, #tpu.memory_space<any>>) dst(%114 : memref<1x128xf32, #tpu.memory_space<vmem>>)
      %c5_i32_85 = arith.constant 5 : i32
      %c0_i32_86 = arith.constant 0 : i32
      %117 = tpu.memref_slice %arg2[%35, %c0_i32_86] : memref<1000x128xf32, #tpu.memory_space<any>> -> memref<1x128xf32, #tpu.memory_space<any>>
      %c5_i32_87 = arith.constant 5 : i32
      %c0_i32_88 = arith.constant 0 : i32
      %118 = tpu.memref_slice %arg12[%c5_i32_87, %c0_i32_88] : memref<16x128xf32, #tpu.memory_space<vmem>> -> memref<1x128xf32, #tpu.memory_space<vmem>>
      %119 = tpu.memref_slice %arg14[%c5_i32_85] : memref<16x!tpu.dma_semaphore, #tpu.memory_space<semaphore_mem>> -> memref<1x!tpu.dma_semaphore, #tpu.memory_space<semaphore_mem>>
      %120 = tpu.memref_squeeze %119 : memref<1x!tpu.dma_semaphore, #tpu.memory_space<semaphore_mem>> -> memref<!tpu.dma_semaphore, #tpu.memory_space<semaphore_mem>>
      tpu.wait_dma2 semaphore(%120 : memref<!tpu.dma_semaphore, #tpu.memory_space<semaphore_mem>>) src(%117 : memref<1x128xf32, #tpu.memory_space<any>>) dst(%118 : memref<1x128xf32, #tpu.memory_space<vmem>>)
      %c6_i32_89 = arith.constant 6 : i32
      %c0_i32_90 = arith.constant 0 : i32
      %121 = tpu.memref_slice %arg2[%40, %c0_i32_90] : memref<1000x128xf32, #tpu.memory_space<any>> -> memref<1x128xf32, #tpu.memory_space<any>>
      %c6_i32_91 = arith.constant 6 : i32
      %c0_i32_92 = arith.constant 0 : i32
      %122 = tpu.memref_slice %arg12[%c6_i32_91, %c0_i32_92] : memref<16x128xf32, #tpu.memory_space<vmem>> -> memref<1x128xf32, #tpu.memory_space<vmem>>
      %123 = tpu.memref_slice %arg14[%c6_i32_89] : memref<16x!tpu.dma_semaphore, #tpu.memory_space<semaphore_mem>> -> memref<1x!tpu.dma_semaphore, #tpu.memory_space<semaphore_mem>>
      %124 = tpu.memref_squeeze %123 : memref<1x!tpu.dma_semaphore, #tpu.memory_space<semaphore_mem>> -> memref<!tpu.dma_semaphore, #tpu.memory_space<semaphore_mem>>
      tpu.wait_dma2 semaphore(%124 : memref<!tpu.dma_semaphore, #tpu.memory_space<semaphore_mem>>) src(%121 : memref<1x128xf32, #tpu.memory_space<any>>) dst(%122 : memref<1x128xf32, #tpu.memory_space<vmem>>)
      %c7_i32_93 = arith.constant 7 : i32
      %c0_i32_94 = arith.constant 0 : i32
      %125 = tpu.memref_slice %arg2[%45, %c0_i32_94] : memref<1000x128xf32, #tpu.memory_space<any>> -> memref<1x128xf32, #tpu.memory_space<any>>
      %c7_i32_95 = arith.constant 7 : i32
      %c0_i32_96 = arith.constant 0 : i32
      %126 = tpu.memref_slice %arg12[%c7_i32_95, %c0_i32_96] : memref<16x128xf32, #tpu.memory_space<vmem>> -> memref<1x128xf32, #tpu.memory_space<vmem>>
      %127 = tpu.memref_slice %arg14[%c7_i32_93] : memref<16x!tpu.dma_semaphore, #tpu.memory_space<semaphore_mem>> -> memref<1x!tpu.dma_semaphore, #tpu.memory_space<semaphore_mem>>
      %128 = tpu.memref_squeeze %127 : memref<1x!tpu.dma_semaphore, #tpu.memory_space<semaphore_mem>> -> memref<!tpu.dma_semaphore, #tpu.memory_space<semaphore_mem>>
      tpu.wait_dma2 semaphore(%128 : memref<!tpu.dma_semaphore, #tpu.memory_space<semaphore_mem>>) src(%125 : memref<1x128xf32, #tpu.memory_space<any>>) dst(%126 : memref<1x128xf32, #tpu.memory_space<vmem>>)
      %c8_i32_97 = arith.constant 8 : i32
      %c0_i32_98 = arith.constant 0 : i32
      %129 = tpu.memref_slice %arg2[%50, %c0_i32_98] : memref<1000x128xf32, #tpu.memory_space<any>> -> memref<1x128xf32, #tpu.memory_space<any>>
      %c8_i32_99 = arith.constant 8 : i32
      %c0_i32_100 = arith.constant 0 : i32
      %130 = tpu.memref_slice %arg12[%c8_i32_99, %c0_i32_100] : memref<16x128xf32, #tpu.memory_space<vmem>> -> memref<1x128xf32, #tpu.memory_space<vmem>>
      %131 = tpu.memref_slice %arg14[%c8_i32_97] : memref<16x!tpu.dma_semaphore, #tpu.memory_space<semaphore_mem>> -> memref<1x!tpu.dma_semaphore, #tpu.memory_space<semaphore_mem>>
      %132 = tpu.memref_squeeze %131 : memref<1x!tpu.dma_semaphore, #tpu.memory_space<semaphore_mem>> -> memref<!tpu.dma_semaphore, #tpu.memory_space<semaphore_mem>>
      tpu.wait_dma2 semaphore(%132 : memref<!tpu.dma_semaphore, #tpu.memory_space<semaphore_mem>>) src(%129 : memref<1x128xf32, #tpu.memory_space<any>>) dst(%130 : memref<1x128xf32, #tpu.memory_space<vmem>>)
      %c9_i32_101 = arith.constant 9 : i32
      %c0_i32_102 = arith.constant 0 : i32
      %133 = tpu.memref_slice %arg2[%55, %c0_i32_102] : memref<1000x128xf32, #tpu.memory_space<any>> -> memref<1x128xf32, #tpu.memory_space<any>>
      %c9_i32_103 = arith.constant 9 : i32
      %c0_i32_104 = arith.constant 0 : i32
      %134 = tpu.memref_slice %arg12[%c9_i32_103, %c0_i32_104] : memref<16x128xf32, #tpu.memory_space<vmem>> -> memref<1x128xf32, #tpu.memory_space<vmem>>
      %135 = tpu.memref_slice %arg14[%c9_i32_101] : memref<16x!tpu.dma_semaphore, #tpu.memory_space<semaphore_mem>> -> memref<1x!tpu.dma_semaphore, #tpu.memory_space<semaphore_mem>>
      %136 = tpu.memref_squeeze %135 : memref<1x!tpu.dma_semaphore, #tpu.memory_space<semaphore_mem>> -> memref<!tpu.dma_semaphore, #tpu.memory_space<semaphore_mem>>
      tpu.wait_dma2 semaphore(%136 : memref<!tpu.dma_semaphore, #tpu.memory_space<semaphore_mem>>) src(%133 : memref<1x128xf32, #tpu.memory_space<any>>) dst(%134 : memref<1x128xf32, #tpu.memory_space<vmem>>)
      %c10_i32_105 = arith.constant 10 : i32
      %c0_i32_106 = arith.constant 0 : i32
      %137 = tpu.memref_slice %arg2[%60, %c0_i32_106] : memref<1000x128xf32, #tpu.memory_space<any>> -> memref<1x128xf32, #tpu.memory_space<any>>
      %c10_i32_107 = arith.constant 10 : i32
      %c0_i32_108 = arith.constant 0 : i32
      %138 = tpu.memref_slice %arg12[%c10_i32_107, %c0_i32_108] : memref<16x128xf32, #tpu.memory_space<vmem>> -> memref<1x128xf32, #tpu.memory_space<vmem>>
      %139 = tpu.memref_slice %arg14[%c10_i32_105] : memref<16x!tpu.dma_semaphore, #tpu.memory_space<semaphore_mem>> -> memref<1x!tpu.dma_semaphore, #tpu.memory_space<semaphore_mem>>
      %140 = tpu.memref_squeeze %139 : memref<1x!tpu.dma_semaphore, #tpu.memory_space<semaphore_mem>> -> memref<!tpu.dma_semaphore, #tpu.memory_space<semaphore_mem>>
      tpu.wait_dma2 semaphore(%140 : memref<!tpu.dma_semaphore, #tpu.memory_space<semaphore_mem>>) src(%137 : memref<1x128xf32, #tpu.memory_space<any>>) dst(%138 : memref<1x128xf32, #tpu.memory_space<vmem>>)
      %c11_i32_109 = arith.constant 11 : i32
      %c0_i32_110 = arith.constant 0 : i32
      %141 = tpu.memref_slice %arg2[%65, %c0_i32_110] : memref<1000x128xf32, #tpu.memory_space<any>> -> memref<1x128xf32, #tpu.memory_space<any>>
      %c11_i32_111 = arith.constant 11 : i32
      %c0_i32_112 = arith.constant 0 : i32
      %142 = tpu.memref_slice %arg12[%c11_i32_111, %c0_i32_112] : memref<16x128xf32, #tpu.memory_space<vmem>> -> memref<1x128xf32, #tpu.memory_space<vmem>>
      %143 = tpu.memref_slice %arg14[%c11_i32_109] : memref<16x!tpu.dma_semaphore, #tpu.memory_space<semaphore_mem>> -> memref<1x!tpu.dma_semaphore, #tpu.memory_space<semaphore_mem>>
      %144 = tpu.memref_squeeze %143 : memref<1x!tpu.dma_semaphore, #tpu.memory_space<semaphore_mem>> -> memref<!tpu.dma_semaphore, #tpu.memory_space<semaphore_mem>>
      tpu.wait_dma2 semaphore(%144 : memref<!tpu.dma_semaphore, #tpu.memory_space<semaphore_mem>>) src(%141 : memref<1x128xf32, #tpu.memory_space<any>>) dst(%142 : memref<1x128xf32, #tpu.memory_space<vmem>>)
      %c12_i32_113 = arith.constant 12 : i32
      %c0_i32_114 = arith.constant 0 : i32
      %145 = tpu.memref_slice %arg2[%70, %c0_i32_114] : memref<1000x128xf32, #tpu.memory_space<any>> -> memref<1x128xf32, #tpu.memory_space<any>>
      %c12_i32_115 = arith.constant 12 : i32
      %c0_i32_116 = arith.constant 0 : i32
      %146 = tpu.memref_slice %arg12[%c12_i32_115, %c0_i32_116] : memref<16x128xf32, #tpu.memory_space<vmem>> -> memref<1x128xf32, #tpu.memory_space<vmem>>
      %147 = tpu.memref_slice %arg14[%c12_i32_113] : memref<16x!tpu.dma_semaphore, #tpu.memory_space<semaphore_mem>> -> memref<1x!tpu.dma_semaphore, #tpu.memory_space<semaphore_mem>>
      %148 = tpu.memref_squeeze %147 : memref<1x!tpu.dma_semaphore, #tpu.memory_space<semaphore_mem>> -> memref<!tpu.dma_semaphore, #tpu.memory_space<semaphore_mem>>
      tpu.wait_dma2 semaphore(%148 : memref<!tpu.dma_semaphore, #tpu.memory_space<semaphore_mem>>) src(%145 : memref<1x128xf32, #tpu.memory_space<any>>) dst(%146 : memref<1x128xf32, #tpu.memory_space<vmem>>)
      %c13_i32_117 = arith.constant 13 : i32
      %c0_i32_118 = arith.constant 0 : i32
      %149 = tpu.memref_slice %arg2[%75, %c0_i32_118] : memref<1000x128xf32, #tpu.memory_space<any>> -> memref<1x128xf32, #tpu.memory_space<any>>
      %c13_i32_119 = arith.constant 13 : i32
      %c0_i32_120 = arith.constant 0 : i32
      %150 = tpu.memref_slice %arg12[%c13_i32_119, %c0_i32_120] : memref<16x128xf32, #tpu.memory_space<vmem>> -> memref<1x128xf32, #tpu.memory_space<vmem>>
      %151 = tpu.memref_slice %arg14[%c13_i32_117] : memref<16x!tpu.dma_semaphore, #tpu.memory_space<semaphore_mem>> -> memref<1x!tpu.dma_semaphore, #tpu.memory_space<semaphore_mem>>
      %152 = tpu.memref_squeeze %151 : memref<1x!tpu.dma_semaphore, #tpu.memory_space<semaphore_mem>> -> memref<!tpu.dma_semaphore, #tpu.memory_space<semaphore_mem>>
      tpu.wait_dma2 semaphore(%152 : memref<!tpu.dma_semaphore, #tpu.memory_space<semaphore_mem>>) src(%149 : memref<1x128xf32, #tpu.memory_space<any>>) dst(%150 : memref<1x128xf32, #tpu.memory_space<vmem>>)
      %c14_i32_121 = arith.constant 14 : i32
      %c0_i32_122 = arith.constant 0 : i32
      %153 = tpu.memref_slice %arg2[%80, %c0_i32_122] : memref<1000x128xf32, #tpu.memory_space<any>> -> memref<1x128xf32, #tpu.memory_space<any>>
      %c14_i32_123 = arith.constant 14 : i32
      %c0_i32_124 = arith.constant 0 : i32
      %154 = tpu.memref_slice %arg12[%c14_i32_123, %c0_i32_124] : memref<16x128xf32, #tpu.memory_space<vmem>> -> memref<1x128xf32, #tpu.memory_space<vmem>>
      %155 = tpu.memref_slice %arg14[%c14_i32_121] : memref<16x!tpu.dma_semaphore, #tpu.memory_space<semaphore_mem>> -> memref<1x!tpu.dma_semaphore, #tpu.memory_space<semaphore_mem>>
      %156 = tpu.memref_squeeze %155 : memref<1x!tpu.dma_semaphore, #tpu.memory_space<semaphore_mem>> -> memref<!tpu.dma_semaphore, #tpu.memory_space<semaphore_mem>>
      tpu.wait_dma2 semaphore(%156 : memref<!tpu.dma_semaphore, #tpu.memory_space<semaphore_mem>>) src(%153 : memref<1x128xf32, #tpu.memory_space<any>>) dst(%154 : memref<1x128xf32, #tpu.memory_space<vmem>>)
      %c15_i32_125 = arith.constant 15 : i32
      %c0_i32_126 = arith.constant 0 : i32
      %157 = tpu.memref_slice %arg2[%85, %c0_i32_126] : memref<1000x128xf32, #tpu.memory_space<any>> -> memref<1x128xf32, #tpu.memory_space<any>>
      %c15_i32_127 = arith.constant 15 : i32
      %c0_i32_128 = arith.constant 0 : i32
      %158 = tpu.memref_slice %arg12[%c15_i32_127, %c0_i32_128] : memref<16x128xf32, #tpu.memory_space<vmem>> -> memref<1x128xf32, #tpu.memory_space<vmem>>
      %159 = tpu.memref_slice %arg14[%c15_i32_125] : memref<16x!tpu.dma_semaphore, #tpu.memory_space<semaphore_mem>> -> memref<1x!tpu.dma_semaphore, #tpu.memory_space<semaphore_mem>>
      %160 = tpu.memref_squeeze %159 : memref<1x!tpu.dma_semaphore, #tpu.memory_space<semaphore_mem>> -> memref<!tpu.dma_semaphore, #tpu.memory_space<semaphore_mem>>
      tpu.wait_dma2 semaphore(%160 : memref<!tpu.dma_semaphore, #tpu.memory_space<semaphore_mem>>) src(%157 : memref<1x128xf32, #tpu.memory_space<any>>) dst(%158 : memref<1x128xf32, #tpu.memory_space<vmem>>)
      %c0_129 = arith.constant 0 : index
      %c0_130 = arith.constant 0 : index
      %161 = vector.load %arg12[%c0_129, %c0_130] : memref<16x128xf32, #tpu.memory_space<vmem>>, vector<16x128xf32>
      %cst_131 = arith.constant 0.000000e+00 : f32
      %162 = vector.broadcast %cst_131 : f32 to vector<16x128xf32>
      %163 = arith.maximumf %161, %162 : vector<16x128xf32>
      %164 = arith.truncf %163 : vector<16x128xf32> to vector<16x128xbf16>
      %c0_132 = arith.constant 0 : index
      %c0_133 = arith.constant 0 : index
      %165 = vector.load %arg4[%c0_132, %c0_133] : memref<128x384xbf16, #tpu.memory_space<vmem>>, vector<128x384xbf16>
      %cst_134 = arith.constant dense<0.000000e+00> : vector<16x384xf32>
      %166 = tpu.matmul %164, %165, %cst_134 {dimension_numbers = #tpu.dot_dimension_numbers<[1], [0], [0], [1], [0, 0, 1, 1], [], []>} : vector<16x128xbf16>, vector<128x384xbf16>, vector<16x384xf32> -> vector<16x384xf32>
      %c0_135 = arith.constant 0 : index
      %c0_136 = arith.constant 0 : index
      %167 = vector.load %arg6[%c0_135, %c0_136] : memref<1x384xf32, #tpu.memory_space<vmem>>, vector<1x384xf32>
      %168 = vector.broadcast %167 : vector<1x384xf32> to vector<16x384xf32>
      %169 = arith.addf %166, %168 : vector<16x384xf32>
      %170 = vector.extract_strided_slice %169 {offsets = [0, 0], sizes = [16, 128], strides = [1, 1]} : vector<16x384xf32> to vector<16x128xf32>
      %171 = vector.extract_strided_slice %169 {offsets = [0, 128], sizes = [16, 128], strides = [1, 1]} : vector<16x384xf32> to vector<16x128xf32>
      %172 = vector.extract_strided_slice %169 {offsets = [0, 256], sizes = [16, 128], strides = [1, 1]} : vector<16x384xf32> to vector<16x128xf32>
      %173 = vector.extract_strided_slice %96 {offsets = [0, 0], sizes = [16, 128], strides = [1, 1]} : vector<16x384xf32> to vector<16x128xf32>
      %174 = vector.extract_strided_slice %96 {offsets = [0, 128], sizes = [16, 128], strides = [1, 1]} : vector<16x384xf32> to vector<16x128xf32>
      %175 = vector.extract_strided_slice %96 {offsets = [0, 256], sizes = [16, 128], strides = [1, 1]} : vector<16x384xf32> to vector<16x128xf32>
      %176 = arith.addf %170, %173 : vector<16x128xf32>
      %177 = arith.negf %176 : vector<16x128xf32>
      %178 = math.exp %177 : vector<16x128xf32>
      %cst_137 = arith.constant 1.000000e+00 : f32
      %179 = vector.broadcast %cst_137 : f32 to vector<16x128xf32>
      %180 = arith.addf %179, %178 : vector<16x128xf32>
      %181 = arith.divf %179, %180 : vector<16x128xf32>
      %182 = arith.addf %171, %174 : vector<16x128xf32>
      %183 = arith.negf %182 : vector<16x128xf32>
      %184 = math.exp %183 : vector<16x128xf32>
      %cst_138 = arith.constant 1.000000e+00 : f32
      %185 = vector.broadcast %cst_138 : f32 to vector<16x128xf32>
      %186 = arith.addf %185, %184 : vector<16x128xf32>
      %187 = arith.divf %185, %186 : vector<16x128xf32>
      %188 = arith.mulf %181, %175 : vector<16x128xf32>
      %189 = arith.addf %172, %188 : vector<16x128xf32>
      %190 = math.tanh %189 : vector<16x128xf32>
      %cst_139 = arith.constant 1.000000e+00 : f32
      %191 = vector.broadcast %cst_139 : f32 to vector<16x128xf32>
      %192 = arith.subf %191, %187 : vector<16x128xf32>
      %193 = arith.mulf %192, %190 : vector<16x128xf32>
      %194 = arith.mulf %187, %90 : vector<16x128xf32>
      %195 = arith.addf %193, %194 : vector<16x128xf32>
      %c0_140 = arith.constant 0 : index
      %c0_141 = arith.constant 0 : index
      %196 = vector.load %arg11[%c0_140, %c0_141] : memref<16x128xf32, #tpu.memory_space<vmem>>, vector<16x128xf32>
      tpu.vector_store %arg11[%c0_140, %c0_141], %195 {strides = array<i32>} : memref<16x128xf32, #tpu.memory_space<vmem>>, vector<16x128xf32>,
      %197 = arith.truncf %195 : vector<16x128xf32> to vector<16x128xbf16>
      %c0_142 = arith.constant 0 : index
      %c0_143 = arith.constant 0 : index
      %198 = vector.load %arg13[%c0_142, %c0_143] : memref<16x128xbf16, #tpu.memory_space<vmem>>, vector<16x128xbf16>
      tpu.vector_store %arg13[%c0_142, %c0_143], %197 {strides = array<i32>} : memref<16x128xbf16, #tpu.memory_space<vmem>>, vector<16x128xbf16>,
    } else {
    }
    %c0 = arith.constant 0 : index
    %c0_1 = arith.constant 0 : index
    %3 = vector.load %arg13[%c0, %c0_1] : memref<16x128xbf16, #tpu.memory_space<vmem>>, vector<16x128xbf16>
    %c0_2 = arith.constant 0 : index
    %c0_3 = arith.constant 0 : index
    %4 = vector.load %arg8[%c0_2, %c0_3] : memref<128x1024xbf16, #tpu.memory_space<vmem>>, vector<128x1024xbf16>
    %cst = arith.constant dense<0.000000e+00> : vector<16x1024xf32>
    %5 = tpu.matmul %3, %4, %cst {dimension_numbers = #tpu.dot_dimension_numbers<[1], [0], [0], [1], [0, 0, 1, 1], [], []>} : vector<16x128xbf16>, vector<128x1024xbf16>, vector<16x1024xf32> -> vector<16x1024xf32>
    %c0_4 = arith.constant 0 : index
    %c0_5 = arith.constant 0 : index
    %6 = vector.load %arg9[%c0_4, %c0_5] : memref<1x1024xf32, #tpu.memory_space<vmem>>, vector<1x1024xf32>
    %7 = vector.broadcast %6 : vector<1x1024xf32> to vector<16x1024xf32>
    %8 = arith.addf %5, %7 : vector<16x1024xf32>
    %c0_6 = arith.constant 0 : index
    %c0_7 = arith.constant 0 : index
    %9 = vector.load %arg10[%c0_6, %c0_7] : memref<16x1024xf32, #tpu.memory_space<vmem>>, vector<16x1024xf32>
    tpu.vector_store %arg10[%c0_6, %c0_7], %8 {strides = array<i32>} : memref<16x1024xf32, #tpu.memory_space<vmem>>, vector<16x1024xf32>,
    return
  }
  func.func @transform_1(%arg0: i32, %arg1: memref<16xi32, #tpu.memory_space<smem>>) -> (i32, i32) {
    %c0_i32 = arith.constant 0 : i32
    %c0_i32_0 = arith.constant 0 : i32
    %c0_i32_1 = arith.constant 0 : i32
    return %c0_i32, %c0_i32_0 : i32, i32
  }
  func.func @transform_2(%arg0: i32, %arg1: memref<16xi32, #tpu.memory_space<smem>>) -> (i32, i32) {
    %c0_i32 = arith.constant 0 : i32
    %c0_i32_0 = arith.constant 0 : i32
    %c0_i32_1 = arith.constant 0 : i32
    return %c0_i32, %c0_i32_0 : i32, i32
  }
  func.func @transform_3(%arg0: i32, %arg1: memref<16xi32, #tpu.memory_space<smem>>) -> (i32, i32) {
    %c0_i32 = arith.constant 0 : i32
    %c0_i32_0 = arith.constant 0 : i32
    %c0_i32_1 = arith.constant 0 : i32
    return %c0_i32, %c0_i32_0 : i32, i32
  }
  func.func @transform_4(%arg0: i32, %arg1: memref<16xi32, #tpu.memory_space<smem>>) -> (i32, i32) {
    %c0_i32 = arith.constant 0 : i32
    %c0_i32_0 = arith.constant 0 : i32
    %c0_i32_1 = arith.constant 0 : i32
    return %c0_i32, %c0_i32_0 : i32, i32
  }
  func.func @transform_5(%arg0: i32, %arg1: memref<16xi32, #tpu.memory_space<smem>>) -> (i32, i32) {
    %c0_i32 = arith.constant 0 : i32
    %c0_i32_0 = arith.constant 0 : i32
    %c0_i32_1 = arith.constant 0 : i32
    return %c0_i32, %c0_i32_0 : i32, i32
  }
  func.func @transform_6(%arg0: i32, %arg1: memref<16xi32, #tpu.memory_space<smem>>) -> (i32, i32) {
    %c0_i32 = arith.constant 0 : i32
    %c0_i32_0 = arith.constant 0 : i32
    return %c0_i32, %arg0 : i32, i32
  }
  func.func @transform_7(%arg0: i32, %arg1: memref<16xi32, #tpu.memory_space<smem>>) -> (i32, i32) {
    %c0_i32 = arith.constant 0 : i32
    %c0_i32_0 = arith.constant 0 : i32
    return %c0_i32, %arg0 : i32, i32
  }
  func.func @transform_8(%arg0: i32, %arg1: memref<16xi32, #tpu.memory_space<smem>>) -> (i32, i32) {
    %c0_i32 = arith.constant 0 : i32
    %c0_i32_0 = arith.constant 0 : i32
    return %c0_i32, %arg0 : i32, i32
  }
  func.func @transform_9(%arg0: i32, %arg1: memref<16xi32, #tpu.memory_space<smem>>) -> (i32, i32) {
    %c0_i32 = arith.constant 0 : i32
    %c0_i32_0 = arith.constant 0 : i32
    %c0_i32_1 = arith.constant 0 : i32
    return %c0_i32, %c0_i32_0 : i32, i32
  }
}

</mosaic_0001>

<bundles_post_ra>
// kernel: _lambda_.1
= control target key start
LH: loop header
LB: loop body
LE: loop exit
PB: predicated region body
PF: predicated region fallthrough
CT: control target
= control target key end

     0   :  { %s2794_s16 = smov [#allocation6]   ;;  %s3233_s0 = inlined_call_operand.vmem [shape: s32[16], index: 0, kind: input, shape index: {}]   ;;  %s3234_s1 = inlined_call_operand.hbm [shape: f32[1000,128], index: 1, kind: input, shape index: {}]   ;;  %s3235_s2 = inlined_call_operand.vmem [shape: f32[16,128], index: 2, kind: input, shape index: {}]   ;;  %s3236_s3 = inlined_call_operand.hbm [shape: bf16[128,384], index: 3, kind: input, shape index: {}]   ;;  %s3237_s4 = inlined_call_operand.hbm [shape: bf16[128,384], index: 4, kind: input, shape index: {}]   ;;  %s3238_s5 = inlined_call_operand.vmem [shape: f32[1,384], index: 5, kind: input, shape index: {}]   ;;  %s3239_s6 = inlined_call_operand.vmem [shape: f32[1,384], index: 6, kind: input, shape index: {}]   ;;  %s3240_s7 = inlined_call_operand.hbm [shape: bf16[128,1024], index: 7, kind: input, shape index: {}]   ;;  %s3241_s8 = inlined_call_operand.vmem [shape: f32[1,1024], index: 8, kind: input, shape index: {}]   ;;  %s3242_s9 = inlined_call_operand.hbm [shape: f32[16,1024], index: 9, kind: output, shape index: {0}]   ;;  %s3243_s10 = inlined_call_operand.vmem [shape: f32[16,128], index: 10, kind: output, shape index: {1}]  }
   0x1   :  { %s17_s15 = sshll.u32 %s3233_s0, 4  ;;  %s18_s15 = int_to_ptr.vmem [resolvable:$true] %s17_s15 }
   0x2   :  { %20 = dma.vmem_to_smem %s18_s15, 16, %s2794_s16, [#allocation5] }
   0x3   :  { %2754 = dma.done.wait [#allocation5], 16 }
   0x4   :  { %2755 = vsyncadd [#allocation5], 4294967280 }
   0x5   :  { %23 = sfence }
   0x6   :  { %24 = vsyncpa [#allocation8], 0 }
   0x7   :  { %25 = vsyncpa [#allocation11], 0 }
   0x8   :  { %26 = vsyncpa [#allocation9], 0  ;;  %s46_s19 = sshll.u32 %s3237_s4, 4  ;;  %s2795_s20 = smov [#allocation10]   ;;  %s47_s19 = int_to_ptr.hbm [resolvable:$true] %s46_s19 }
   0x9   :  { %s48_s21 = sshll.u32 %s2795_s20, 4  ;;  %s33_s0 = sshll.u32 %s3236_s3, 4  ;;  %s49_s21 = int_to_ptr.vmem [resolvable:$true] %s48_s21  ;;  %s34_s0 = int_to_ptr.hbm [resolvable:$true] %s33_s0 }
   0xa   :  { %s2796_s24 = smov 192   ;;  %s2797_s25 = smov 12  }
   0xb   :  { %54 = dma.hbm_to_vmem [thread:$0]  %s47_s19, 3072, %s49_s21, [#allocation11], %s2796_s24, %s2796_s24, %s2797_s25  }
   0xc   :  { %s2798_s26 = smov [#allocation7]   ;;  %s63_s30 = sshll.u32 %s3240_s7, 4  ;;  %s64_s30 = int_to_ptr.hbm [resolvable:$true] %s63_s30 }
   0xd   :  { %s35_s27 = sshll.u32 %s2798_s26, 4  ;;  %s2799_s4 = smov [#allocation12]   ;;  %s36_s27 = int_to_ptr.vmem [resolvable:$true] %s35_s27 }
   0xe   :  { %41 = dma.hbm_to_vmem [thread:$0]  %s34_s0, 3072, %s36_s27, [#allocation8], %s2796_s24, %s2796_s24, %s2797_s25  }
   0xf   :  { %s65_s11 = sshll.u32 %s2799_s4, 4  ;;  %s2800_s12 = smov 512   ;;  %s66_s11 = int_to_ptr.vmem [resolvable:$true] %s65_s11 }
  0x10   :  { %s2801_s13 = smov 32  }
  0x11   :  { %71 = dma.hbm_to_vmem [thread:$0]  %s64_s30, 8192, %s66_s11, [#allocation11], %s2800_s12, %s2800_s12, %s2801_s13  }
  0x12   :  { %2756 = dma.done.wait [#allocation8], 3072  }
  0x13   :  { %2757 = vsyncadd [#allocation8], 4294964224 }
  0x14   :  { %2758 = dma.done.wait [#allocation11], 11264  }
  0x15   :  { %2759 = vsyncadd [#allocation11], 4294956032  ;;  %s2888_s3 = sld [smem:[#allocation6]]  ;;  %v1711_v0 = vld [vmem:[#allocation10 + $0xa8] sm:$0xf]  ;;  %s2802_s7 = smov [#allocation2]  }
  0x16   :  { %v2119_v1 = vld [vmem:[#allocation10 + $0xb0] sm:$0xf0]  ;;  %v2118_v2 = vld [vmem:[#allocation10 + $0xac] sm:$0xf]  ;;  %v1713_v4 = vld [vmem:[#allocation10 + $0xb4] sm:$0xf0] }
  0x17   :  { %v1712_v3 = vor.u32 %v2119_v1, %v1711_v0  ;;  %v1719_v5 = vld [vmem:[#allocation10 + $0xb0] sm:$0xf]  ;;  %v2120_v6 = vld [vmem:[#allocation10 + $0xb8] sm:$0xf0]  ;;  %v1716_v7 = vor.u32 %v2118_v2, %v1713_v4  ;;  %v2115_v11 = vld [vmem:[#allocation10 + $0x94] sm:$0xf] }
  0x18   :  { %v1720_v8 = vor.u32 %v2120_v6, %v1719_v5  ;;  %v1699_v9 = vld [vmem:[#allocation10 + $0x90] sm:$0xf]  ;;  %v2116_v10 = vld [vmem:[#allocation10 + $0x98] sm:$0xf0]  ;;  %v1701_v13 = vld [vmem:[#allocation10 + $0x9c] sm:$0xf0] }
  0x19   :  { %531 = vmatpush.bf16.msra.mxu0 %v1712_v3  ;;  %v1700_v12 = vor.u32 %v2116_v10, %v1699_v9  ;;  %v1707_v14 = vld [vmem:[#allocation10 + $0x98] sm:$0xf]  ;;  %v2117_v15 = vld [vmem:[#allocation10 + $0xa0] sm:$0xf0]  ;;  %545 = vmatpush.bf16.msra.mxu1 %v1716_v7  ;;  %v1704_v16 = vor.u32 %v2115_v11, %v1701_v13  ;;  %v2112_v20 = vld [vmem:[#allocation10 + $0x7c] sm:$0xf] }
  0x1a   :  { %559 = vmatpush.bf16.msra.mxu2 %v1720_v8  ;;  %v1708_v17 = vor.u32 %v2117_v15, %v1707_v14  ;;  %v1687_v18 = vld [vmem:[#allocation10 + $0x78] sm:$0xf]  ;;  %v2113_v19 = vld [vmem:[#allocation10 + $0x80] sm:$0xf0]  ;;  %v1689_v21 = vld [vmem:[#allocation10 + $0x84] sm:$0xf0] }
  0x1b   :  { %v1695_v22 = vld [vmem:[#allocation10 + $0x80] sm:$0xf]  ;;  %v2114_v23 = vld [vmem:[#allocation10 + $0x88] sm:$0xf0]  ;;  %v1688_v24 = vor.u32 %v2113_v19, %v1687_v18  ;;  %v1692_v25 = vor.u32 %v2112_v20, %v1689_v21  ;;  %v2109_v29 = vld [vmem:[#allocation10 + $0x64] sm:$0xf]  ;;  %s91_s17 = scalar_lea.hbm %s3234_s1, %s2888_s3 }
  0x1c   :  { %v1696_v26 = vor.u32 %v2114_v23, %v1695_v22  ;;  %v1675_v27 = vld [vmem:[#allocation10 + $0x60] sm:$0xf]  ;;  %v2110_v28 = vld [vmem:[#allocation10 + $0x68] sm:$0xf0]  ;;  %v1677_v30 = vld [vmem:[#allocation10 + $0x6c] sm:$0xf0] }
  0x1d   :  { %532 = vmatpush.bf16.msra.mxu0 %v1700_v12  ;;  %546 = vmatpush.bf16.msra.mxu1 %v1704_v16  ;;  %v1683_v31 = vld [vmem:[#allocation10 + $0x68] sm:$0xf]  ;;  %v2111_v32 = vld [vmem:[#allocation10 + $0x70] sm:$0xf0]  ;;  %v1676_v33 = vor.u32 %v2110_v28, %v1675_v27  ;;  %s2890_s14 = sshll.u32 %s2802_s7, 4  ;;  %v1680_v34 = vor.u32 %v2109_v29, %v1677_v30  ;;  %s99_s18 = sshll.u32 %s91_s17, 4  ;;  %s102_s14 = int_to_ptr.vmem [resolvable:$true] %s2890_s14  ;;  %s100_s18 = int_to_ptr.hbm [resolvable:$true] %s99_s18 }
  0x1e   :  { %560 = vmatpush.bf16.msra.mxu2 %v1708_v17  ;;  %v1684_v35 = vor.u32 %v2111_v32, %v1683_v31  ;;  %v1663_v36 = vld [vmem:[#allocation10 + $0x48] sm:$0xf]  ;;  %v2107_v37 = vld [vmem:[#allocation10 + $0x50] sm:$0xf0]  ;;  %v2106_v38 = vld [vmem:[#allocation10 + $0x4c] sm:$0xf] }
  0x1f   :  { %v1665_v39 = vld [vmem:[#allocation10 + $0x54] sm:$0xf0]  ;;  %v1671_v40 = vld [vmem:[#allocation10 + $0x50] sm:$0xf]  ;;  %v2108_v41 = vld [vmem:[#allocation10 + $0x58] sm:$0xf0]  ;;  %v1664_v42 = vor.u32 %v2107_v37, %v1663_v36 }
  0x20   :  { %v1651_v43 = vld [vmem:[#allocation10 + $0x30] sm:$0xf]  ;;  %v1668_v44 = vor.u32 %v2106_v38, %v1665_v39  ;;  %v1672_v45 = vor.u32 %v2108_v41, %v1671_v40  ;;  %v2104_v46 = vld [vmem:[#allocation10 + $0x38] sm:$0xf0]  ;;  %v2103_v47 = vld [vmem:[#allocation10 + $0x34] sm:$0xf] }
  0x21   :  { %533 = vmatpush.bf16.msra.mxu0 %v1688_v24  ;;  %547 = vmatpush.bf16.msra.mxu1 %v1692_v25  ;;  %v1653_v48 = vld [vmem:[#allocation10 + $0x3c] sm:$0xf0]  ;;  %v1659_v49 = vld [vmem:[#allocation10 + $0x38] sm:$0xf]  ;;  %v2105_v50 = vld [vmem:[#allocation10 + $0x40] sm:$0xf0] }
  0x22   :  { %561 = vmatpush.bf16.msra.mxu2 %v1696_v26  ;;  %s2346_s19 = sshra.s32 %s100_s18, 4  ;;  %s2900_s23 = scalar_lea.hbm %s3234_s1, 1000  ;;  %s2347_s19 = int_to_ptr.hbm [resolvable:$true] %s2346_s19 }
  0x23   :  { %s2348_s20 = scalar_lea.hbm %s2347_s19, 1  ;;  %p2351_p1 = scmp.lt.s32.totalorder %s2347_s19, %s3234_s1 }
  0x24   :  { %p2349_p0 = scmp.ne.s32.totalorder %s2347_s19, %s2348_s20  ;;  %p2352_p2 = scmp.lt.s32.totalorder %s2900_s23, %s2348_s20 }
  0x25   :  { %534 = vmatpush.bf16.msra.mxu0 %v1676_v33  ;;  %548 = vmatpush.bf16.msra.mxu1 %v1680_v34 }
  0x26   :  { %562 = vmatpush.bf16.msra.mxu2 %v1684_v35  ;;  %p2353_p3 = por %p2352_p2, %p2351_p1 }
  0x28   :  { %p2354_p4 = pnand %p2353_p3, %p2349_p0 }
  0x2a   :  { %2357 = shalt.err (!%p2354_p4)  }
  0x2b   :  { %104 = dma.hbm_to_vmem [thread:$0]  %s100_s18, 16, %s102_s14, [#allocation4]  ;;  %535 = vmatpush.bf16.msra.mxu0 %v1664_v42  ;;  %v1652_v51 = vor.u32 %v2104_v46, %v1651_v43  ;;  %549 = vmatpush.bf16.msra.mxu1 %v1668_v44  ;;  %v1656_v52 = vor.u32 %v2103_v47, %v1653_v48  ;;  %v1660_v53 = vor.u32 %v2105_v50, %v1659_v49  ;;  %v1639_v54 = vld [vmem:[#allocation10 + $0x18] sm:$0xf]  ;;  %v2101_v55 = vld [vmem:[#allocation10 + $0x20] sm:$0xf0] }
  0x2c   :  { %563 = vmatpush.bf16.msra.mxu2 %v1672_v45  ;;  %v2100_v56 = vld [vmem:[#allocation10 + $0x1c] sm:$0xf]  ;;  %v1641_v57 = vld [vmem:[#allocation10 + $0x24] sm:$0xf0]  ;;  %v1647_v58 = vld [vmem:[#allocation10 + $0x20] sm:$0xf]  ;;  %v1640_v60 = vor.u32 %v2101_v55, %v1639_v54 }
  0x2d   :  { %v2102_v59 = vld [vmem:[#allocation10 + $0x28] sm:$0xf0]  ;;  %v1627_v61 = vld [vmem:[#allocation10] sm:$0xf]  ;;  %v1644_v63 = vor.u32 %v2100_v56, %v1641_v57  ;;  %v2097_v1 = vld [vmem:[#allocation10 + $0x4] sm:$0xf] }
  0x2e   :  { %v2098_v62 = vld [vmem:[#allocation10 + $0x8] sm:$0xf0]  ;;  %v1648_v0 = vor.u32 %v2102_v59, %v1647_v58  ;;  %v1629_v2 = vld [vmem:[#allocation10 + $0xc] sm:$0xf0]  ;;  %s1610_s25 = sld [smem:[#allocation6 + $0x1]]  ;;  %s2803_s15 = smov [#allocation2 + $0x1]  }
  0x2f   :  { %536 = vmatpush.bf16.msra.mxu0 %v1652_v51  ;;  %550 = vmatpush.bf16.msra.mxu1 %v1656_v52  ;;  %v1635_v3 = vld [vmem:[#allocation10 + $0x8] sm:$0xf]  ;;  %v2099_v4 = vld [vmem:[#allocation10 + $0x10] sm:$0xf0]  ;;  %s2906_s26 = sld [smem:[#allocation6 + $0x2]]  ;;  %v1628_v5 = vor.u32 %v2098_v62, %v1627_v61  ;;  %v1632_v8 = vor.u32 %v2097_v1, %v1629_v2  ;;  %s118_s16 = sshll.u32 %s2803_s15, 4  ;;  %s119_s16 = int_to_ptr.vmem [resolvable:$true] %s118_s16 }
  0x30   :  { %564 = vmatpush.bf16.msra.mxu2 %v1660_v53  ;;  %s2908_s27 = sld [smem:[#allocation6 + $0x3]]  ;;  %v2913_v6 = vld [vmem:[%s3235_s2] sm:$0xff]  ;;  %v2918_v7 = vld [vmem:[%s3235_s2 + $0x8] sm:$0xff]  ;;  %v1636_v9 = vor.u32 %v2099_v4, %v1635_v3 }
  0x31   :  { %s2920_s11 = sld [smem:[#allocation6 + $0x4]]  ;;  %v362_v10 = vpack.c.bf16 %v2918_v7, %v2913_v6 }
  0x32   :  { %s2922_s12 = sld [smem:[#allocation6 + $0x5]] }
  0x33   :  { %537 = vmatpush.bf16.msra.mxu0 %v1640_v60  ;;  %551 = vmatpush.bf16.msra.mxu1 %v1644_v63  ;;  %s2924_s13 = sld [smem:[#allocation6 + $0x6]] }
  0x34   :  { %565 = vmatpush.bf16.msra.mxu2 %v1648_v0  ;;  %s106_s14 = scalar_lea.hbm %s3234_s1, %s1610_s25 }
  0x35   :  { %s116_s2 = sshll.u32 %s106_s14, 4  ;;  %s117_s2 = int_to_ptr.hbm [resolvable:$true] %s116_s2 }
  0x36   :  { %s2370_s17 = sshra.s32 %s117_s2, 4  ;;  %s2371_s17 = int_to_ptr.hbm [resolvable:$true] %s2370_s17 }
  0x37   :  { %538 = vmatpush.bf16.msra.mxu0 %v1628_v5  ;;  %552 = vmatpush.bf16.msra.mxu1 %v1632_v8  ;;  %s2372_s18 = scalar_lea.hbm %s2371_s17, 1  ;;  %p2375_p6 = scmp.lt.s32.totalorder %s2371_s17, %s3234_s1 }
  0x38   :  { %566 = vmatpush.bf16.msra.mxu2 %v1636_v9  ;;  %p2373_p5 = scmp.ne.s32.totalorder %s2371_s17, %s2372_s18  ;;  %p2376_p7 = scmp.lt.s32.totalorder %s2900_s23, %s2372_s18 }
  0x3a   :  { %p2377_p8 = por %p2376_p7, %p2375_p6 }
  0x3c   :  { %p2378_p9 = pnand %p2377_p8, %p2373_p5 }
  0x3e   :  { %2381 = shalt.err (!%p2378_p9)  }
  0x3f   :  { %121 = dma.hbm_to_vmem [thread:$0]  %s117_s2, 16, %s119_s16, [#allocation4 + $0x1]  ;;  %539 = vmatmul.bf16.vlgmr.msra.gmra.mxu0 %v362_v10  ;;  %553 = vmatmul.bf16.vlgmr.msra.gmra.mxu1 %v362_v10 }
  0x40   :  { %s123_s0 = scalar_lea.hbm %s3234_s1, %s2906_s26  ;;  %567 = vmatmul.bf16.vlgmr.msra.gmra.mxu2 %v362_v10  ;;  %s2804_s25 = smov [#allocation2 + $0x2]  }
  0x41   :  { %s133_s24 = sshll.u32 %s123_s0, 4  ;;  %s135_s28 = sshll.u32 %s2804_s25, 4  ;;  %s134_s24 = int_to_ptr.hbm [resolvable:$true] %s133_s24  ;;  %s136_s28 = int_to_ptr.vmem [resolvable:$true] %s135_s28 }
  0x42   :  { %s2394_s29 = sshra.s32 %s134_s24, 4  ;;  %s2395_s29 = int_to_ptr.hbm [resolvable:$true] %s2394_s29 }
  0x43   :  { %s2396_s30 = scalar_lea.hbm %s2395_s29, 1  ;;  %p2399_p11 = scmp.lt.s32.totalorder %s2395_s29, %s3234_s1 }
  0x44   :  { %p2397_p10 = scmp.ne.s32.totalorder %s2395_s29, %s2396_s30  ;;  %p2400_p12 = scmp.lt.s32.totalorder %s2900_s23, %s2396_s30 }
  0x46   :  { %p2401_p13 = por %p2400_p12, %p2399_p11 }
  0x48   :  { %p2402_p0 = pnand %p2401_p13, %p2397_p10 }
  0x4a   :  { %2405 = shalt.err (!%p2402_p0)  }
  0x4b   :  { %138 = dma.hbm_to_vmem [thread:$0]  %s134_s24, 16, %s136_s28, [#allocation4 + $0x2] }
  0x4c   :  { %s140_s14 = scalar_lea.hbm %s3234_s1, %s2908_s27  ;;  %s2805_s15 = smov [#allocation2 + $0x3]  }
  0x4d   :  { %s150_s2 = sshll.u32 %s140_s14, 4  ;;  %s152_s16 = sshll.u32 %s2805_s15, 4  ;;  %s151_s2 = int_to_ptr.hbm [resolvable:$true] %s150_s2  ;;  %s153_s16 = int_to_ptr.vmem [resolvable:$true] %s152_s16 }
  0x4e   :  { %s2418_s17 = sshra.s32 %s151_s2, 4  ;;  %s2419_s17 = int_to_ptr.hbm [resolvable:$true] %s2418_s17 }
  0x4f   :  { %s2420_s18 = scalar_lea.hbm %s2419_s17, 1  ;;  %p2423_p2 = scmp.lt.s32.totalorder %s2419_s17, %s3234_s1 }
  0x50   :  { %p2421_p1 = scmp.ne.s32.totalorder %s2419_s17, %s2420_s18  ;;  %p2424_p3 = scmp.lt.s32.totalorder %s2900_s23, %s2420_s18 }
  0x52   :  { %p2425_p4 = por %p2424_p3, %p2423_p2 }
  0x54   :  { %p2426_p5 = pnand %p2425_p4, %p2421_p1 }
  0x56   :  { %2429 = shalt.err (!%p2426_p5)  }
  0x57   :  { %155 = dma.hbm_to_vmem [thread:$0]  %s151_s2, 16, %s153_s16, [#allocation4 + $0x3] }
  0x58   :  { %s157_s22 = scalar_lea.hbm %s3234_s1, %s2920_s11  ;;  %s2806_s24 = smov [#allocation2 + $0x4]  }
  0x59   :  { %s167_s0 = sshll.u32 %s157_s22, 4  ;;  %s169_s25 = sshll.u32 %s2806_s24, 4  ;;  %s168_s0 = int_to_ptr.hbm [resolvable:$true] %s167_s0  ;;  %s170_s25 = int_to_ptr.vmem [resolvable:$true] %s169_s25 }
  0x5a   :  { %s2442_s28 = sshra.s32 %s168_s0, 4  ;;  %s2443_s28 = int_to_ptr.hbm [resolvable:$true] %s2442_s28 }
  0x5b   :  { %s2444_s29 = scalar_lea.hbm %s2443_s28, 1  ;;  %p2447_p7 = scmp.lt.s32.totalorder %s2443_s28, %s3234_s1 }
  0x5c   :  { %p2445_p6 = scmp.ne.s32.totalorder %s2443_s28, %s2444_s29  ;;  %p2448_p8 = scmp.lt.s32.totalorder %s2900_s23, %s2444_s29 }
  0x5e   :  { %p2449_p9 = por %p2448_p8, %p2447_p7 }
  0x60   :  { %p2450_p10 = pnand %p2449_p9, %p2445_p6 }
  0x62   :  { %2453 = shalt.err (!%p2450_p10)  }
  0x63   :  { %172 = dma.hbm_to_vmem [thread:$0]  %s168_s0, 16, %s170_s25, [#allocation4 + $0x4] }
  0x64   :  { %s174_s26 = scalar_lea.hbm %s3234_s1, %s2922_s12  ;;  %s2807_s14 = smov [#allocation2 + $0x5]  }
  0x65   :  { %s184_s7 = sshll.u32 %s174_s26, 4  ;;  %s186_s2 = sshll.u32 %s2807_s14, 4  ;;  %s185_s7 = int_to_ptr.hbm [resolvable:$true] %s184_s7  ;;  %s187_s2 = int_to_ptr.vmem [resolvable:$true] %s186_s2 }
  0x66   :  { %s2466_s15 = sshra.s32 %s185_s7, 4  ;;  %s2467_s15 = int_to_ptr.hbm [resolvable:$true] %s2466_s15 }
  0x67   :  { %s2468_s16 = scalar_lea.hbm %s2467_s15, 1  ;;  %p2471_p12 = scmp.lt.s32.totalorder %s2467_s15, %s3234_s1 }
  0x68   :  { %p2469_p11 = scmp.ne.s32.totalorder %s2467_s15, %s2468_s16  ;;  %p2472_p13 = scmp.lt.s32.totalorder %s2900_s23, %s2468_s16 }
  0x6a   :  { %p2473_p0 = por %p2472_p13, %p2471_p12 }
  0x6c   :  { %p2474_p1 = pnand %p2473_p0, %p2469_p11 }
  0x6e   :  { %2477 = shalt.err (!%p2474_p1)  }
  0x6f   :  { %189 = dma.hbm_to_vmem [thread:$0]  %s185_s7, 16, %s187_s2, [#allocation4 + $0x5] }
  0x70   :  { %s191_s20 = scalar_lea.hbm %s3234_s1, %s2924_s13  ;;  %s2808_s21 = smov [#allocation2 + $0x6]  }
  0x71   :  { %s201_s27 = sshll.u32 %s191_s20, 4  ;;  %s203_s22 = sshll.u32 %s2808_s21, 4  ;;  %s202_s27 = int_to_ptr.hbm [resolvable:$true] %s201_s27  ;;  %s204_s22 = int_to_ptr.vmem [resolvable:$true] %s203_s22 }
  0x72   :  { %s2490_s0 = sshra.s32 %s202_s27, 4  ;;  %s2491_s0 = int_to_ptr.hbm [resolvable:$true] %s2490_s0 }
  0x73   :  { %s2492_s24 = scalar_lea.hbm %s2491_s0, 1  ;;  %p2495_p3 = scmp.lt.s32.totalorder %s2491_s0, %s3234_s1 }
  0x74   :  { %p2493_p2 = scmp.ne.s32.totalorder %s2491_s0, %s2492_s24  ;;  %p2496_p4 = scmp.lt.s32.totalorder %s2900_s23, %s2492_s24 }
  0x76   :  { %p2497_p5 = por %p2496_p4, %p2495_p3 }
  0x78   :  { %p2498_p6 = pnand %p2497_p5, %p2493_p2 }
  0x7a   :  { %2501 = shalt.err (!%p2498_p6)  }
  0x7b   :  { %206 = dma.hbm_to_vmem [thread:$0]  %s202_s27, 16, %s204_s22, [#allocation4 + $0x6] }
  0x7c   :  { %s1616_s29 = sld [smem:[#allocation6 + $0x7]]  ;;  %s2809_s13 = smov [#allocation2 + $0x7]  }
  0x7d   :  { %s220_s30 = sshll.u32 %s2809_s13, 4  ;;  %s1617_s4 = sld [smem:[#allocation6 + $0x8]]  ;;  %s221_s30 = int_to_ptr.vmem [resolvable:$true] %s220_s30 }
  0x7e   :  { %s2810_s11 = smov [#allocation2 + $0x8]   ;;  %s2977_s26 = sld [smem:[#allocation6 + $0x9]] }
  0x7f   :  { %s2975_s3 = sshll.u32 %s2810_s11, 4  ;;  %s2811_s7 = smov [#allocation2 + $0x9]   ;;  %s238_s3 = int_to_ptr.vmem [resolvable:$true] %s2975_s3 }
  0x80   :  { %s2980_s14 = sshll.u32 %s2811_s7, 4  ;;  %s2982_s2 = sld [smem:[#allocation6 + $0xa]]  ;;  %s255_s14 = int_to_ptr.vmem [resolvable:$true] %s2980_s14 }
  0x82   :  { %s208_s17 = scalar_lea.hbm %s3234_s1, %s1616_s29 }
  0x83   :  { %s218_s18 = sshll.u32 %s208_s17, 4  ;;  %s225_s20 = scalar_lea.hbm %s3234_s1, %s1617_s4  ;;  %s219_s18 = int_to_ptr.hbm [resolvable:$true] %s218_s18 }
  0x84   :  { %s235_s27 = sshll.u32 %s225_s20, 4  ;;  %s2514_s21 = sshra.s32 %s219_s18, 4  ;;  %s2515_s21 = int_to_ptr.hbm [resolvable:$true] %s2514_s21  ;;  %s236_s27 = int_to_ptr.hbm [resolvable:$true] %s235_s27 }
  0x85   :  { %s2516_s22 = scalar_lea.hbm %s2515_s21, 1  ;;  %p2519_p8 = scmp.lt.s32.totalorder %s2515_s21, %s3234_s1 }
  0x86   :  { %p2517_p7 = scmp.ne.s32.totalorder %s2515_s21, %s2516_s22  ;;  %p2520_p9 = scmp.lt.s32.totalorder %s2900_s23, %s2516_s22 }
  0x88   :  { %p2521_p10 = por %p2520_p9, %p2519_p8 }
  0x8a   :  { %p2522_p11 = pnand %p2521_p10, %p2517_p7 }
  0x8c   :  { %2525 = shalt.err (!%p2522_p11)  }
  0x8d   :  { %223 = dma.hbm_to_vmem [thread:$0]  %s219_s18, 16, %s221_s30, [#allocation4 + $0x7] }
  0x8e   :  { %s242_s29 = scalar_lea.hbm %s3234_s1, %s2977_s26  ;;  %s2538_s13 = sshra.s32 %s236_s27, 4  ;;  %s2539_s13 = int_to_ptr.hbm [resolvable:$true] %s2538_s13 }
  0x8f   :  { %s2540_s4 = scalar_lea.hbm %s2539_s13, 1  ;;  %p2543_p13 = scmp.lt.s32.totalorder %s2539_s13, %s3234_s1 }
  0x90   :  { %p2541_p12 = scmp.ne.s32.totalorder %s2539_s13, %s2540_s4  ;;  %p2544_p0 = scmp.lt.s32.totalorder %s2900_s23, %s2540_s4 }
  0x92   :  { %p2545_p1 = por %p2544_p0, %p2543_p13 }
  0x94   :  { %p2546_p2 = pnand %p2545_p1, %p2541_p12 }
  0x96   :  { %2549 = shalt.err (!%p2546_p2)  }
  0x97   :  { %240 = dma.hbm_to_vmem [thread:$0]  %s236_s27, 16, %s238_s3, [#allocation4 + $0x8] }
  0x98   :  { %s252_s30 = sshll.u32 %s242_s29, 4  ;;  %s259_s16 = scalar_lea.hbm %s3234_s1, %s2982_s2  ;;  %s253_s30 = int_to_ptr.hbm [resolvable:$true] %s252_s30 }
  0x99   :  { %s269_s17 = sshll.u32 %s259_s16, 4  ;;  %s2562_s18 = sshra.s32 %s253_s30, 4  ;;  %s2563_s18 = int_to_ptr.hbm [resolvable:$true] %s2562_s18  ;;  %s270_s17 = int_to_ptr.hbm [resolvable:$true] %s269_s17 }
  0x9a   :  { %s2564_s12 = scalar_lea.hbm %s2563_s18, 1  ;;  %p2567_p4 = scmp.lt.s32.totalorder %s2563_s18, %s3234_s1 }
  0x9b   :  { %p2565_p3 = scmp.ne.s32.totalorder %s2563_s18, %s2564_s12  ;;  %p2568_p5 = scmp.lt.s32.totalorder %s2900_s23, %s2564_s12 }
  0x9d   :  { %p2569_p6 = por %p2568_p5, %p2567_p4 }
  0x9f   :  { %p2570_p7 = pnand %p2569_p6, %p2565_p3 }
  0xa1   :  { %2573 = shalt.err (!%p2570_p7)  }
  0xa2   :  { %257 = dma.hbm_to_vmem [thread:$0]  %s253_s30, 16, %s255_s14, [#allocation4 + $0x9] }
  0xa3   :  { %s2812_s3 = smov [#allocation2 + $0xa]   ;;  %s1620_s27 = sld [smem:[#allocation6 + $0xb]] }
  0xa4   :  { %s271_s2 = sshll.u32 %s2812_s3, 4  ;;  %s2586_s21 = sshra.s32 %s270_s17, 4  ;;  %s272_s2 = int_to_ptr.vmem [resolvable:$true] %s271_s2  ;;  %s2587_s21 = int_to_ptr.hbm [resolvable:$true] %s2586_s21 }
  0xa5   :  { %s2588_s22 = scalar_lea.hbm %s2587_s21, 1  ;;  %p2591_p9 = scmp.lt.s32.totalorder %s2587_s21, %s3234_s1 }
  0xa6   :  { %p2589_p8 = scmp.ne.s32.totalorder %s2587_s21, %s2588_s22  ;;  %p2592_p10 = scmp.lt.s32.totalorder %s2900_s23, %s2588_s22 }
  0xa8   :  { %p2593_p11 = por %p2592_p10, %p2591_p9 }
  0xaa   :  { %p2594_p12 = pnand %p2593_p11, %p2589_p8 }
  0xac   :  { %2597 = shalt.err (!%p2594_p12)  }
  0xad   :  { %274 = dma.hbm_to_vmem [thread:$0]  %s270_s17, 16, %s272_s2, [#allocation4 + $0xa] }
  0xae   :  { %s2813_s25 = smov [#allocation2 + $0xb]   ;;  %s1621_s28 = sld [smem:[#allocation6 + $0xc]] }
  0xaf   :  { %s288_s14 = sshll.u32 %s2813_s25, 4  ;;  %s2814_s29 = smov [#allocation2 + $0xc]   ;;  %s289_s14 = int_to_ptr.vmem [resolvable:$true] %s288_s14 }
  0xb0   :  { %s3019_s13 = sshll.u32 %s2814_s29, 4  ;;  %s1622_s4 = sld [smem:[#allocation6 + $0xd]]  ;;  %s306_s13 = int_to_ptr.vmem [resolvable:$true] %s3019_s13 }
  0xb1   :  { %s276_s30 = scalar_lea.hbm %s3234_s1, %s1620_s27  ;;  %s2815_s26 = smov [#allocation2 + $0xd]  }
  0xb2   :  { %s286_s15 = sshll.u32 %s276_s30, 4  ;;  %s3025_s16 = sshll.u32 %s2815_s26, 4  ;;  %s287_s15 = int_to_ptr.hbm [resolvable:$true] %s286_s15  ;;  %s323_s16 = int_to_ptr.vmem [resolvable:$true] %s3025_s16 }
  0xb3   :  { %s2610_s17 = sshra.s32 %s287_s15, 4  ;;  %s2611_s17 = int_to_ptr.hbm [resolvable:$true] %s2610_s17 }
  0xb4   :  { %s2612_s18 = scalar_lea.hbm %s2611_s17, 1  ;;  %p2615_p0 = scmp.lt.s32.totalorder %s2611_s17, %s3234_s1 }
  0xb5   :  { %p2613_p13 = scmp.ne.s32.totalorder %s2611_s17, %s2612_s18  ;;  %p2616_p1 = scmp.lt.s32.totalorder %s2900_s23, %s2612_s18 }
  0xb7   :  { %p2617_p2 = por %p2616_p1, %p2615_p0 }
  0xb9   :  { %p2618_p3 = pnand %p2617_p2, %p2613_p13 }
  0xbb   :  { %2621 = shalt.err (!%p2618_p3)  }
  0xbc   :  { %291 = dma.hbm_to_vmem [thread:$0]  %s287_s15, 16, %s289_s14, [#allocation4 + $0xb] }
  0xbd   :  { %s293_s2 = scalar_lea.hbm %s3234_s1, %s1621_s28  ;;  %s310_s0 = scalar_lea.hbm %s3234_s1, %s1622_s4 }
  0xbe   :  { %s303_s27 = sshll.u32 %s293_s2, 4  ;;  %s320_s24 = sshll.u32 %s310_s0, 4  ;;  %s304_s27 = int_to_ptr.hbm [resolvable:$true] %s303_s27  ;;  %s321_s24 = int_to_ptr.hbm [resolvable:$true] %s320_s24 }
  0xbf   :  { %s2634_s25 = sshra.s32 %s304_s27, 4  ;;  %s2635_s25 = int_to_ptr.hbm [resolvable:$true] %s2634_s25 }
  0xc0   :  { %s2636_s29 = scalar_lea.hbm %s2635_s25, 1  ;;  %p2639_p5 = scmp.lt.s32.totalorder %s2635_s25, %s3234_s1 }
  0xc1   :  { %p2637_p4 = scmp.ne.s32.totalorder %s2635_s25, %s2636_s29  ;;  %p2640_p6 = scmp.lt.s32.totalorder %s2900_s23, %s2636_s29 }
  0xc3   :  { %p2641_p7 = por %p2640_p6, %p2639_p5 }
  0xc5   :  { %p2642_p8 = pnand %p2641_p7, %p2637_p4 }
  0xc7   :  { %2645 = shalt.err (!%p2642_p8)  }
  0xc8   :  { %308 = dma.hbm_to_vmem [thread:$0]  %s304_s27, 16, %s306_s13, [#allocation4 + $0xc] }
  0xc9   :  { %s1623_s28 = sld [smem:[#allocation6 + $0xe]]  ;;  %s2658_s4 = sshra.s32 %s321_s24, 4  ;;  %s2659_s4 = int_to_ptr.hbm [resolvable:$true] %s2658_s4 }
  0xca   :  { %s2660_s7 = scalar_lea.hbm %s2659_s4, 1  ;;  %p2663_p10 = scmp.lt.s32.totalorder %s2659_s4, %s3234_s1 }
  0xcb   :  { %p2661_p9 = scmp.ne.s32.totalorder %s2659_s4, %s2660_s7  ;;  %p2664_p11 = scmp.lt.s32.totalorder %s2900_s23, %s2660_s7 }
  0xcd   :  { %p2665_p12 = por %p2664_p11, %p2663_p10 }
  0xcf   :  { %p2666_p13 = pnand %p2665_p12, %p2661_p9 }
  0xd1   :  { %2669 = shalt.err (!%p2666_p13)  }
  0xd2   :  { %325 = dma.hbm_to_vmem [thread:$0]  %s321_s24, 16, %s323_s16, [#allocation4 + $0xd] }
  0xd3   :  { %s1624_s26 = sld [smem:[#allocation6 + $0xf]]  ;;  %s2816_s17 = smov [#allocation2 + $0xe]  }
  0xd4   :  { %s339_s18 = sshll.u32 %s2816_s17, 4  ;;  %s2817_s13 = smov [#allocation2 + $0xf]   ;;  %s340_s18 = int_to_ptr.vmem [resolvable:$true] %s339_s18 }
  0xd5   :  { %s3048_s12 = sshll.u32 %s2817_s13, 4  ;;  %s327_s3 = scalar_lea.hbm %s3234_s1, %s1623_s28  ;;  %s357_s12 = int_to_ptr.vmem [resolvable:$true] %s3048_s12 }
  0xd6   :  { %s337_s2 = sshll.u32 %s327_s3, 4  ;;  %s338_s2 = int_to_ptr.hbm [resolvable:$true] %s337_s2 }
  0xd7   :  { %s2682_s22 = sshra.s32 %s338_s2, 4  ;;  %s2683_s22 = int_to_ptr.hbm [resolvable:$true] %s2682_s22 }
  0xd8   :  { %s2684_s0 = scalar_lea.hbm %s2683_s22, 1  ;;  %p2687_p1 = scmp.lt.s32.totalorder %s2683_s22, %s3234_s1 }
  0xd9   :  { %s344_s16 = scalar_lea.hbm %s3234_s1, %s1624_s26  ;;  %p2685_p0 = scmp.ne.s32.totalorder %s2683_s22, %s2684_s0 }
  0xda   :  { %p2688_p2 = scmp.lt.s32.totalorder %s2900_s23, %s2684_s0 }
  0xdc   :  { %p2689_p3 = por %p2688_p2, %p2687_p1 }
  0xde   :  { %p2690_p4 = pnand %p2689_p3, %p2685_p0 }
  0xe0   :  { %2693 = shalt.err (!%p2690_p4)  }
  0xe1   :  { %342 = dma.hbm_to_vmem [thread:$0]  %s338_s2, 16, %s340_s18, [#allocation4 + $0xe] }
  0xe2   :  { %s354_s29 = sshll.u32 %s344_s16, 4  ;;  %s355_s29 = int_to_ptr.hbm [resolvable:$true] %s354_s29 }
  0xe3   :  { %s2706_s11 = sshra.s32 %s355_s29, 4  ;;  %s2707_s11 = int_to_ptr.hbm [resolvable:$true] %s2706_s11 }
  0xe4   :  { %s2708_s14 = scalar_lea.hbm %s2707_s11, 1  ;;  %p2711_p6 = scmp.lt.s32.totalorder %s2707_s11, %s3234_s1 }
  0xe5   :  { %p2709_p5 = scmp.ne.s32.totalorder %s2707_s11, %s2708_s14  ;;  %p2712_p7 = scmp.lt.s32.totalorder %s2900_s23, %s2708_s14 }
  0xe7   :  { %p2713_p8 = por %p2712_p7, %p2711_p6 }
  0xe9   :  { %p2714_p9 = pnand %p2713_p8, %p2709_p5 }
  0xeb   :  { %2717 = shalt.err (!%p2714_p9)  }
  0xec   :  { %359 = dma.hbm_to_vmem [thread:$0]  %s355_s29, 16, %s357_s12, [#allocation4 + $0xf]  ;;  %v395_v11 = vld [vmem:[%s3239_s6] sm:$0x7]  ;;  %v540_v14 = vpop.f32.mrf.mxu0  ;;  %v554_v16 = vpop.f32.mrf.mxu1 }
  0xed   :  { %v397_v12 = vperm.slane %v395_v11, 0  ;;  %v398_v13 = vperm.slane %v395_v11, 1  ;;  %v399_v18 = vperm.slane %v395_v11, 2  ;;  %v568_v19 = vpop.f32.mrf.mxu2 }
  0xef   :  { %v3068_v15 = vadd.f32 %v540_v14, %v397_v12  ;;  %v3070_v17 = vadd.f32 %v554_v16, %v398_v13  ;;  %v3072_v20 = vadd.f32 %v568_v19, %v399_v18 }
  0xf4   :  { %v542_v21 = vpop.f32.mrf.mxu0  ;;  %v556_v23 = vpop.f32.mrf.mxu1 }
  0xf5   :  { %v3074_v22 = vadd.f32 %v542_v21, %v397_v12  ;;  %v3076_v24 = vadd.f32 %v556_v23, %v398_v13  ;;  %v570_v25 = vpop.f32.mrf.mxu2 }
  0xf6   :  { %v3078_v26 = vadd.f32 %v570_v25, %v399_v18 }
  0xf7   :  { %2760 = dma.done.wait [#allocation4], 16 }
  0xf8   :  { %2761 = vsyncadd [#allocation4], 4294967280 }
  0xf9   :  { %2762 = dma.done.wait [#allocation4 + $0x1], 16 }
  0xfa   :  { %2763 = vsyncadd [#allocation4 + $0x1], 4294967280 }
  0xfb   :  { %2764 = dma.done.wait [#allocation4 + $0x2], 16 }
  0xfc   :  { %2765 = vsyncadd [#allocation4 + $0x2], 4294967280 }
  0xfd   :  { %2766 = dma.done.wait [#allocation4 + $0x3], 16 }
  0xfe   :  { %2767 = vsyncadd [#allocation4 + $0x3], 4294967280 }
  0xff   :  { %2768 = dma.done.wait [#allocation4 + $0x4], 16 }
 0x100   :  { %2769 = vsyncadd [#allocation4 + $0x4], 4294967280 }
 0x101   :  { %2770 = dma.done.wait [#allocation4 + $0x5], 16 }
 0x102   :  { %2771 = vsyncadd [#allocation4 + $0x5], 4294967280 }
 0x103   :  { %2772 = dma.done.wait [#allocation4 + $0x6], 16 }
 0x104   :  { %2773 = vsyncadd [#allocation4 + $0x6], 4294967280 }
 0x105   :  { %2774 = dma.done.wait [#allocation4 + $0x7], 16 }
 0x106   :  { %2775 = vsyncadd [#allocation4 + $0x7], 4294967280 }
 0x107   :  { %2776 = dma.done.wait [#allocation4 + $0x8], 16 }
 0x108   :  { %2777 = vsyncadd [#allocation4 + $0x8], 4294967280 }
 0x109   :  { %2778 = dma.done.wait [#allocation4 + $0x9], 16 }
 0x10a   :  { %2779 = vsyncadd [#allocation4 + $0x9], 4294967280 }
 0x10b   :  { %2780 = dma.done.wait [#allocation4 + $0xa], 16 }
 0x10c   :  { %2781 = vsyncadd [#allocation4 + $0xa], 4294967280 }
 0x10d   :  { %2782 = dma.done.wait [#allocation4 + $0xb], 16 }
 0x10e   :  { %2783 = vsyncadd [#allocation4 + $0xb], 4294967280 }
 0x10f   :  { %2784 = dma.done.wait [#allocation4 + $0xc], 16 }
 0x110   :  { %2785 = vsyncadd [#allocation4 + $0xc], 4294967280 }
 0x111   :  { %2786 = dma.done.wait [#allocation4 + $0xd], 16 }
 0x112   :  { %2787 = vsyncadd [#allocation4 + $0xd], 4294967280 }
 0x113   :  { %2788 = dma.done.wait [#allocation4 + $0xe], 16 }
 0x114   :  { %2789 = vsyncadd [#allocation4 + $0xe], 4294967280 }
 0x115   :  { %2790 = dma.done.wait [#allocation4 + $0xf], 16 }
 0x116   :  { %2791 = vsyncadd [#allocation4 + $0xf], 4294967280  ;;  %v1807_v27 = vld [vmem:[#allocation7 + $0xa8] sm:$0xf]  ;;  %v2143_v28 = vld [vmem:[#allocation7 + $0xb0] sm:$0xf0] }
 0x117   :  { %v2142_v29 = vld [vmem:[#allocation7 + $0xac] sm:$0xf]  ;;  %v1808_v30 = vor.u32 %v2143_v28, %v1807_v27  ;;  %v1809_v31 = vld [vmem:[#allocation7 + $0xb4] sm:$0xf0]  ;;  %v1795_v32 = vld [vmem:[#allocation7 + $0x90] sm:$0xf] }
 0x118   :  { %v2140_v33 = vld [vmem:[#allocation7 + $0x98] sm:$0xf0]  ;;  %v1812_v34 = vor.u32 %v2142_v29, %v1809_v31  ;;  %v2139_v35 = vld [vmem:[#allocation7 + $0x94] sm:$0xf]  ;;  %v1797_v36 = vld [vmem:[#allocation7 + $0x9c] sm:$0xf0] }
 0x119   :  { %779 = vmatpush.bf16.msra.mxu3 %v1808_v30  ;;  %v1796_v37 = vor.u32 %v2140_v33, %v1795_v32  ;;  %v1800_v38 = vor.u32 %v2139_v35, %v1797_v36  ;;  %v1783_v39 = vld [vmem:[#allocation7 + $0x78] sm:$0xf]  ;;  %v2137_v40 = vld [vmem:[#allocation7 + $0x80] sm:$0xf0]  ;;  %v2136_v41 = vld [vmem:[#allocation7 + $0x7c] sm:$0xf] }
 0x11a   :  { %793 = vmatpush.bf16.msrb.mxu0 %v1812_v34  ;;  %v1785_v42 = vld [vmem:[#allocation7 + $0x84] sm:$0xf0]  ;;  %v1784_v43 = vor.u32 %v2137_v40, %v1783_v39  ;;  %v1771_v45 = vld [vmem:[#allocation7 + $0x60] sm:$0xf]  ;;  %v2134_v46 = vld [vmem:[#allocation7 + $0x68] sm:$0xf0] }
 0x11b   :  { %v1788_v44 = vor.u32 %v2136_v41, %v1785_v42  ;;  %v2133_v47 = vld [vmem:[#allocation7 + $0x64] sm:$0xf]  ;;  %v1773_v48 = vld [vmem:[#allocation7 + $0x6c] sm:$0xf0]  ;;  %v1772_v50 = vor.u32 %v2134_v46, %v1771_v45  ;;  %v1759_v51 = vld [vmem:[#allocation7 + $0x48] sm:$0xf] }
 0x11c   :  { %v1815_v49 = vld [vmem:[#allocation7 + $0xb0] sm:$0xf]  ;;  %v2144_v52 = vld [vmem:[#allocation7 + $0xb8] sm:$0xf0]  ;;  %v1776_v53 = vor.u32 %v2133_v47, %v1773_v48  ;;  %v2131_v54 = vld [vmem:[#allocation7 + $0x50] sm:$0xf0] }
 0x11d   :  { %780 = vmatpush.bf16.msra.mxu3 %v1796_v37  ;;  %v1816_v55 = vor.u32 %v2144_v52, %v1815_v49  ;;  %v1803_v56 = vld [vmem:[#allocation7 + $0x98] sm:$0xf]  ;;  %v2141_v57 = vld [vmem:[#allocation7 + $0xa0] sm:$0xf0]  ;;  %v2130_v58 = vld [vmem:[#allocation7 + $0x4c] sm:$0xf]  ;;  %v1760_v61 = vor.u32 %v2131_v54, %v1759_v51 }
 0x11e   :  { %794 = vmatpush.bf16.msrb.mxu0 %v1800_v38  ;;  %v1761_v59 = vld [vmem:[#allocation7 + $0x54] sm:$0xf0]  ;;  %v1804_v60 = vor.u32 %v2141_v57, %v1803_v56  ;;  %v1791_v62 = vld [vmem:[#allocation7 + $0x80] sm:$0xf]  ;;  %v2138_v63 = vld [vmem:[#allocation7 + $0x88] sm:$0xf0] }
 0x11f   :  { %807 = vmatpush.bf16.msrb.mxu1 %v1816_v55  ;;  %v1764_v0 = vor.u32 %v2130_v58, %v1761_v59  ;;  %v1747_v1 = vld [vmem:[#allocation7 + $0x30] sm:$0xf]  ;;  %v2128_v2 = vld [vmem:[#allocation7 + $0x38] sm:$0xf0]  ;;  %v2127_v3 = vld [vmem:[#allocation7 + $0x34] sm:$0xf]  ;;  %v1792_v5 = vor.u32 %v2138_v63, %v1791_v62 }
 0x120   :  { %v1749_v4 = vld [vmem:[#allocation7 + $0x3c] sm:$0xf0]  ;;  %v1748_v8 = vor.u32 %v2128_v2, %v1747_v1  ;;  %v1779_v9 = vld [vmem:[#allocation7 + $0x68] sm:$0xf]  ;;  %v2135_v10 = vld [vmem:[#allocation7 + $0x70] sm:$0xf0] }
 0x121   :  { %781 = vmatpush.bf16.msra.mxu3 %v1784_v43  ;;  %v1752_v11 = vor.u32 %v2127_v3, %v1749_v4  ;;  %v1735_v12 = vld [vmem:[#allocation7 + $0x18] sm:$0xf]  ;;  %v2125_v13 = vld [vmem:[#allocation7 + $0x20] sm:$0xf0]  ;;  %v2124_v14 = vld [vmem:[#allocation7 + $0x1c] sm:$0xf]  ;;  %v1780_v19 = vor.u32 %v2135_v10, %v1779_v9 }
 0x122   :  { %795 = vmatpush.bf16.msrb.mxu0 %v1788_v44  ;;  %v1737_v16 = vld [vmem:[#allocation7 + $0x24] sm:$0xf0]  ;;  %v1736_v21 = vor.u32 %v2125_v13, %v1735_v12  ;;  %v607_v23 = vld [vmem:[#allocation2 + $0x8] sm:$0xff]  ;;  %v2132_v27 = vld [vmem:[#allocation7 + $0x58] sm:$0xf0]  ;;  %s1465_s19 = sshll.u32 %s3242_s9, 4  ;;  %s1466_s19 = int_to_ptr.hbm [resolvable:$true] %s1465_s19 }
 0x123   :  { %808 = vmatpush.bf16.msrb.mxu1 %v1804_v60  ;;  %v606_v18 = vld [vmem:[#allocation2] sm:$0xff]  ;;  %v1767_v25 = vld [vmem:[#allocation7 + $0x50] sm:$0xf]  ;;  %v1740_v28 = vor.u32 %v2124_v14, %v1737_v16  ;;  %v1723_v29 = vld [vmem:[#allocation7] sm:$0xf]  ;;  %v609_v34 = vmax.f32 %v607_v23, 0.0 }
 0x124   :  { %v2122_v30 = vld [vmem:[#allocation7 + $0x8] sm:$0xf0]  ;;  %v2121_v31 = vld [vmem:[#allocation7 + $0x4] sm:$0xf]  ;;  %v1725_v32 = vld [vmem:[#allocation7 + $0xc] sm:$0xf0]  ;;  %v1768_v35 = vor.u32 %v2132_v27, %v1767_v25 }
 0x125   :  { %782 = vmatpush.bf16.msra.mxu3 %v1772_v50  ;;  %v608_v33 = vmax.f32 %v606_v18, 0.0  ;;  %v1724_v36 = vor.u32 %v2122_v30, %v1723_v29  ;;  %v1755_v37 = vld [vmem:[#allocation7 + $0x38] sm:$0xf]  ;;  %v2129_v38 = vld [vmem:[#allocation7 + $0x40] sm:$0xf0]  ;;  %v1728_v39 = vor.u32 %v2121_v31, %v1725_v32  ;;  %s2819_s20 = smov 1024  }
 0x126   :  { %796 = vmatpush.bf16.msrb.mxu0 %v1776_v53  ;;  %v1756_v41 = vor.u32 %v2129_v38, %v1755_v37  ;;  %v1743_v42 = vld [vmem:[#allocation7 + $0x20] sm:$0xf]  ;;  %v2126_v43 = vld [vmem:[#allocation7 + $0x28] sm:$0xf0]  ;;  %v1731_v45 = vld [vmem:[#allocation7 + $0x8] sm:$0xf] }
 0x127   :  { %809 = vmatpush.bf16.msrb.mxu1 %v1792_v5  ;;  %v610_v40 = vpack.c.bf16 %v609_v34, %v608_v33  ;;  %v1744_v44 = vor.u32 %v2126_v43, %v1743_v42  ;;  %v2123_v46 = vld [vmem:[#allocation7 + $0x10] sm:$0xf0]  ;;  %v3083_v48 = vld [vmem:[%s3238_s5] sm:$0x7]  ;;  %v2051_v49 = vld [vmem:[#allocation12 + $0x1c0] sm:$0xf] }
 0x128   :  { %v1732_v47 = vor.u32 %v2123_v46, %v1731_v45  ;;  %v2206_v50 = vld [vmem:[#allocation12 + $0x1dc] sm:$0xf0]  ;;  %v2202_v51 = vld [vmem:[#allocation12 + $0x1c4] sm:$0xf]  ;;  %v2059_v54 = vld [vmem:[#allocation12 + $0x1c8] sm:$0xf] }
 0x129   :  { %783 = vmatpush.bf16.msra.mxu3 %v1760_v61  ;;  %v2052_v52 = vor.u32 %v2206_v50, %v2051_v49  ;;  %v2053_v53 = vld [vmem:[#allocation12 + $0x1e0] sm:$0xf0]  ;;  %v2207_v55 = vld [vmem:[#allocation12 + $0x1e4] sm:$0xf0]  ;;  %v2203_v58 = vld [vmem:[#allocation12 + $0x1cc] sm:$0xf] }
 0x12a   :  { %797 = vmatpush.bf16.msrb.mxu0 %v1764_v0  ;;  %v2056_v56 = vor.u32 %v2202_v51, %v2053_v53  ;;  %v2060_v57 = vor.u32 %v2207_v55, %v2059_v54  ;;  %v2061_v59 = vld [vmem:[#allocation12 + $0x1e8] sm:$0xf0]  ;;  %v646_v60 = vperm.slane %v3083_v48, 1  ;;  %v2019_v62 = vld [vmem:[#allocation12 + $0x180] sm:$0xf]  ;;  %v645_v13 = vperm.slane %v3083_v48, 0 }
 0x12b   :  { %810 = vmatpush.bf16.msrb.mxu1 %v1780_v19  ;;  %1331 = vmatpush.bf16.msrb.mxu2 %v2052_v52  ;;  %v2064_v61 = vor.u32 %v2203_v58, %v2061_v59  ;;  %v2198_v63 = vld [vmem:[#allocation12 + $0x19c] sm:$0xf0]  ;;  %v2194_v0 = vld [vmem:[#allocation12 + $0x184] sm:$0xf]  ;;  %v2027_v3 = vld [vmem:[#allocation12 + $0x188] sm:$0xf] }
 0x12c   :  { %v2020_v1 = vor.u32 %v2198_v63, %v2019_v62  ;;  %v2021_v2 = vld [vmem:[#allocation12 + $0x1a0] sm:$0xf0]  ;;  %v2199_v4 = vld [vmem:[#allocation12 + $0x1a4] sm:$0xf0]  ;;  %v2195_v10 = vld [vmem:[#allocation12 + $0x18c] sm:$0xf] }
 0x12d   :  { %784 = vmatpush.bf16.msra.mxu3 %v1748_v8  ;;  %v2024_v8 = vor.u32 %v2194_v0, %v2021_v2  ;;  %v2028_v9 = vor.u32 %v2199_v4, %v2027_v3  ;;  %v1987_v16 = vld [vmem:[#allocation12 + $0x140] sm:$0xf]  ;;  %v2186_v19 = vld [vmem:[#allocation12 + $0x144] sm:$0xf]  ;;  %v1995_v27 = vld [vmem:[#allocation12 + $0x148] sm:$0xf] }
 0x12e   :  { %798 = vmatpush.bf16.msrb.mxu0 %v1752_v11  ;;  %v2029_v11 = vld [vmem:[#allocation12 + $0x1a8] sm:$0xf0]  ;;  %v2190_v18 = vld [vmem:[#allocation12 + $0x15c] sm:$0xf0]  ;;  %v1989_v25 = vld [vmem:[#allocation12 + $0x160] sm:$0xf0] }
 0x12f   :  { %811 = vmatpush.bf16.msrb.mxu1 %v1768_v35  ;;  %1332 = vmatpush.bf16.msrb.mxu2 %v2020_v1  ;;  %v2032_v14 = vor.u32 %v2195_v10, %v2029_v11  ;;  %v1988_v23 = vor.u32 %v2190_v18, %v1987_v16  ;;  %v2191_v29 = vld [vmem:[#allocation12 + $0x164] sm:$0xf0]  ;;  %v2187_v30 = vld [vmem:[#allocation12 + $0x14c] sm:$0xf]  ;;  %v1955_v37 = vld [vmem:[#allocation12 + $0x100] sm:$0xf] }
 0x130   :  { %v1997_v31 = vld [vmem:[#allocation12 + $0x168] sm:$0xf0]  ;;  %v1996_v34 = vor.u32 %v2191_v29, %v1995_v27  ;;  %v2182_v38 = vld [vmem:[#allocation12 + $0x11c] sm:$0xf0]  ;;  %v2183_v42 = vld [vmem:[#allocation12 + $0x124] sm:$0xf0] }
 0x131   :  { %785 = vmatpush.bf16.msra.mxu3 %v1736_v21  ;;  %v2000_v35 = vor.u32 %v2187_v30, %v1997_v31  ;;  %v1965_v49 = vld [vmem:[#allocation12 + $0x128] sm:$0xf0]  ;;  %v1923_v53 = vld [vmem:[#allocation12 + $0xc0] sm:$0xf]  ;;  %v1925_v58 = vld [vmem:[#allocation12 + $0xe0] sm:$0xf0] }
 0x132   :  { %799 = vmatpush.bf16.msrb.mxu0 %v1740_v28  ;;  %v1992_v28 = vor.u32 %v2186_v19, %v1989_v25  ;;  %v2174_v54 = vld [vmem:[#allocation12 + $0xdc] sm:$0xf0]  ;;  %v2171_v62 = vld [vmem:[#allocation12 + $0xcc] sm:$0xf]  ;;  %v2162_v10 = vld [vmem:[#allocation12 + $0x84] sm:$0xf] }
 0x133   :  { %812 = vmatpush.bf16.msrb.mxu1 %v1756_v41  ;;  %1333 = vmatpush.bf16.msrb.mxu2 %v1988_v23  ;;  %v1963_v41 = vld [vmem:[#allocation12 + $0x108] sm:$0xf]  ;;  %v1933_v63 = vld [vmem:[#allocation12 + $0xe8] sm:$0xf0]  ;;  %v1893_v11 = vld [vmem:[#allocation12 + $0xa0] sm:$0xf0] }
 0x134   :  { %v1964_v46 = vor.u32 %v2183_v42, %v1963_v41  ;;  %v1936_v3 = vor.u32 %v2171_v62, %v1933_v63  ;;  %v2167_v16 = vld [vmem:[#allocation12 + $0xa4] sm:$0xf0]  ;;  %v2163_v18 = vld [vmem:[#allocation12 + $0x8c] sm:$0xf]  ;;  %v1896_v19 = vor.u32 %v2162_v10, %v1893_v11  ;;  %v2158_v30 = vld [vmem:[#allocation12 + $0x5c] sm:$0xf0] }
 0x135   :  { %786 = vmatpush.bf16.msra.mxu3 %v1724_v36  ;;  %v2154_v31 = vld [vmem:[#allocation12 + $0x44] sm:$0xf]  ;;  %v1827_v41 = vld [vmem:[#allocation12] sm:$0xf]  ;;  %v2067_v63 = vld [vmem:[#allocation12 + $0x1d0] sm:$0xf] }
 0x136   :  { %800 = vmatpush.bf16.msrb.mxu0 %v1728_v39  ;;  %v1956_v39 = vor.u32 %v2182_v38, %v1955_v37  ;;  %s2820_s3 = smov 64  }
 0x137   :  { %813 = vmatpush.bf16.msrb.mxu1 %v1744_v44 }
 0x138   :  { %787 = vmatmul.bf16.vlgmr.msra.gmra.mxu3 %v610_v40  ;;  %1334 = vmatpush.bf16.msrb.mxu2 %v1956_v39 }
 0x139   :  { %801 = vmatmul.bf16.vlgmr.msrb.gmra.mxu0 %v610_v40  ;;  %1345 = vmatpush.bf16.msrb.mxu3 %v2056_v56  ;;  %v1924_v56 = vor.u32 %v2174_v54, %v1923_v53 }
 0x13a   :  { %1359 = vmatpush.bf16.msra.mxu0 %v2060_v57  ;;  %v2170_v57 = vld [vmem:[#allocation12 + $0xc4] sm:$0xf] }
 0x13b   :  { %814 = vmatpush.bf16.msrb.mxu1 %v1732_v47  ;;  %v2179_v47 = vld [vmem:[#allocation12 + $0x10c] sm:$0xf]  ;;  %v1928_v59 = vor.u32 %v2170_v57, %v1925_v58 }
 0x13c   :  { %v1968_v51 = vor.u32 %v2179_v47, %v1965_v49  ;;  %1335 = vmatpush.bf16.msrb.mxu2 %v1924_v56  ;;  %v2147_v57 = vld [vmem:[#allocation12 + $0xc] sm:$0xf] }
 0x13d   :  { %1346 = vmatpush.bf16.msrb.mxu3 %v2024_v8  ;;  %v2166_v8 = vld [vmem:[#allocation12 + $0x9c] sm:$0xf0]  ;;  %v1837_v58 = vld [vmem:[#allocation12 + $0x28] sm:$0xf0] }
 0x13e   :  { %815 = vmatmul.bf16.vlgmr.msrb.gmra.mxu1 %v610_v40  ;;  %1360 = vmatpush.bf16.msra.mxu0 %v2028_v9  ;;  %v1957_v40 = vld [vmem:[#allocation12 + $0x120] sm:$0xf0]  ;;  %v1840_v62 = vor.u32 %v2147_v57, %v1837_v58  ;;  %v2193_v58 = vld [vmem:[#allocation12 + $0x174] sm:$0xf0] }
 0x13f   :  { %1373 = vmatpush.bf16.msra.mxu1 %v2064_v61  ;;  %v2175_v61 = vld [vmem:[#allocation12 + $0xe4] sm:$0xf0] }
 0x141   :  { %1347 = vmatpush.bf16.msrb.mxu3 %v1992_v28  ;;  %v1859_v28 = vld [vmem:[#allocation12 + $0x40] sm:$0xf] }
 0x142   :  { %1361 = vmatpush.bf16.msra.mxu0 %v1996_v34  ;;  %v2159_v34 = vld [vmem:[#allocation12 + $0x64] sm:$0xf0] }
 0x143   :  { %1374 = vmatpush.bf16.msra.mxu1 %v2032_v14 }
 0x146   :  { %1362 = vmatpush.bf16.msra.mxu0 %v1964_v46 }
 0x147   :  { %1375 = vmatpush.bf16.msra.mxu1 %v2000_v35 }
 0x14b   :  { %1376 = vmatpush.bf16.msra.mxu1 %v1968_v51  ;;  %v1835_v51 = vld [vmem:[#allocation12 + $0x8] sm:$0xf] }
 0x14f   :  { %1377 = vmatpush.bf16.msra.mxu1 %v1936_v3  ;;  %v2069_v3 = vld [vmem:[#allocation12 + $0x1f0] sm:$0xf0] }
 0x1b6   :  { %v802_v5 = vpop.f32.mrf.mxu0 }
 0x1b7   :  { %v803_v12 = vadd.f32 %v802_v5, %v646_v60  ;;  %v1891_v5 = vld [vmem:[#allocation12 + $0x80] sm:$0xf] }
 0x1b8   :  { %v1892_v9 = vor.u32 %v2166_v8, %v1891_v5  ;;  %v2209_v8 = vld [vmem:[#allocation12 + $0x1f4] sm:$0xf0] }
 0x1b9   :  { %v861_v21 = vadd.f32 %v803_v12, %v3070_v17  ;;  %v2178_v17 = vld [vmem:[#allocation12 + $0x104] sm:$0xf]  ;;  %v1899_v12 = vld [vmem:[#allocation12 + $0x88] sm:$0xf] }
 0x1ba   :  { %v1960_v45 = vor.u32 %v2178_v17, %v1957_v40  ;;  %1336 = vmatpush.bf16.msrb.mxu2 %v1892_v9  ;;  %v1869_v40 = vld [vmem:[#allocation12 + $0x68] sm:$0xf0]  ;;  %v2205_v9 = vld [vmem:[#allocation12 + $0x1dc] sm:$0xf] }
 0x1bb   :  { %v1819_v32 = vmul.f32 -1.442695, %v861_v21  ;;  %v788_v33 = vpop.f32.mrf.mxu3  ;;  %v1900_v21 = vor.u32 %v2167_v16, %v1899_v12  ;;  %v2077_v16 = vld [vmem:[#allocation12 + $0x1f8] sm:$0xf0] }
 0x1bc   :  { %v789_v36 = vadd.f32 %v788_v33, %v645_v13  ;;  %1348 = vmatpush.bf16.msrb.mxu3 %v1960_v45  ;;  %v1867_v33 = vld [vmem:[#allocation12 + $0x48] sm:$0xf]  ;;  %v1829_v45 = vld [vmem:[#allocation12 + $0x20] sm:$0xf0] }
 0x1bd   :  { %2242 = vpow2.f32 %v1819_v32  ;;  %v1860_v32 = vor.u32 %v2158_v30, %v1859_v28  ;;  %v1868_v39 = vor.u32 %v2159_v34, %v1867_v33  ;;  %v816_v28 = vpop.f32.mrf.mxu1  ;;  %v2037_v33 = vld [vmem:[#allocation12 + $0x1b0] sm:$0xf0]  ;;  %v2043_v34 = vld [vmem:[#allocation12 + $0x198] sm:$0xf] }
 0x1be   :  { %v821_v43 = vadd.f32 %v789_v36, %v3068_v15  ;;  %v804_v44 = vpop.f32.mrf.mxu0  ;;  %v1931_v15 = vld [vmem:[#allocation12 + $0xc8] sm:$0xf]  ;;  %v2155_v36 = vld [vmem:[#allocation12 + $0x4c] sm:$0xf] }
 0x1bf   :  { %v805_v50 = vadd.f32 %v804_v44, %v646_v60  ;;  %v1932_v2 = vor.u32 %v2175_v61, %v1931_v15  ;;  %1337 = vmatpush.bf16.msrb.mxu2 %v1860_v32  ;;  %v2146_v44 = vld [vmem:[#allocation12 + $0x4] sm:$0xf]  ;;  %v1872_v47 = vor.u32 %v2155_v36, %v1869_v40  ;;  %v2197_v40 = vld [vmem:[#allocation12 + $0x19c] sm:$0xf] }
 0x1c0   :  { %v1817_v52 = vmul.f32 -1.442695, %v821_v43  ;;  %1349 = vmatpush.bf16.msrb.mxu3 %v1928_v59  ;;  %v2150_v43 = vld [vmem:[#allocation12 + $0x1c] sm:$0xf0] }
 0x1c1   :  { %v862_v55 = vadd.f32 %v805_v50, %v3076_v24  ;;  %1363 = vmatpush.bf16.msra.mxu0 %v1932_v2  ;;  %v1828_v49 = vor.u32 %v2150_v43, %v1827_v41  ;;  %v1832_v50 = vor.u32 %v2146_v44, %v1829_v45  ;;  %v2204_v2 = vld [vmem:[#allocation12 + $0x1d4] sm:$0xf]  ;;  %v2045_v44 = vld [vmem:[#allocation12 + $0x1b8] sm:$0xf0]  ;;  %v2003_v45 = vld [vmem:[#allocation12 + $0x150] sm:$0xf] }
 0x1c2   :  { %2244 = vpow2.f32 %v1817_v52  ;;  %v2151_v52 = vld [vmem:[#allocation12 + $0x24] sm:$0xf0]  ;;  %v2072_v12 = vor.u32 %v2204_v2, %v2069_v3  ;;  %v1971_v2 = vld [vmem:[#allocation12 + $0x110] sm:$0xf] }
 0x1c3   :  { %v2243_v60 = vpop.eup %2242  ;;  %v1820_v0 = vmul.f32 -1.442695, %v862_v55  ;;  %v790_v1 = vpop.f32.mrf.mxu3  ;;  %v1836_v56 = vor.u32 %v2151_v52, %v1835_v51  ;;  %1338 = vmatpush.bf16.msrb.mxu2 %v1828_v49  ;;  %v2188_v52 = vld [vmem:[#allocation12 + $0x154] sm:$0xf] }
 0x1c4   :  { %v3092_v4 = vadd.f32 1.0, %v2243_v60  ;;  %v791_v24 = vadd.f32 %v790_v1, %v645_v13  ;;  %v1901_v13 = vld [vmem:[#allocation12 + $0xa8] sm:$0xf0]  ;;  %1350 = vmatpush.bf16.msrb.mxu3 %v1896_v19  ;;  %v2208_v60 = vld [vmem:[#allocation12 + $0x1ec] sm:$0xf0] }
 0x1c5   :  { %2246 = vpow2.f32 %v1820_v0  ;;  %v1904_v27 = vor.u32 %v2163_v18, %v1901_v13  ;;  %1364 = vmatpush.bf16.msra.mxu0 %v1900_v21  ;;  %v2068_v1 = vor.u32 %v2208_v60, %v2067_v63  ;;  %v2035_v18 = vld [vmem:[#allocation12 + $0x190] sm:$0xf]  ;;  %v647_v13 = vperm.slane %v3083_v48, 2 }
 0x1c6   :  { %2248 = vrcp.f32 %v3092_v4  ;;  %v822_v14 = vadd.f32 %v791_v24, %v3074_v22  ;;  %v1861_v22 = vld [vmem:[#allocation12 + $0x60] sm:$0xf0]  ;;  %v882_v54 = vand.u32 2147483648, %v3092_v4  ;;  %v2075_v24 = vld [vmem:[#allocation12 + $0x1d8] sm:$0xf]  ;;  %vm876_vm0 = vweird.f32 %v3092_v4 }
 0x1c7   :  { %1378 = vmatpush.bf16.msra.mxu1 %v1904_v27  ;;  %v1864_v17 = vor.u32 %v2154_v31, %v1861_v22  ;;  %v880_v5 = vand.u32 2147483647, %v3092_v4  ;;  %1387 = vmatpush.bf16.msra.mxu2 %v2068_v1  ;;  %v2080_v22 = vor.u32 %v2205_v9, %v2077_v16  ;;  %v1979_v16 = vld [vmem:[#allocation12 + $0x118] sm:$0xf]  ;;  %v2176_v31 = vld [vmem:[#allocation12 + $0xec] sm:$0xf0] }
 0x1c8   :  { %v2245_v23 = vpop.eup %2244  ;;  %v1818_v25 = vmul.f32 -1.442695, %v822_v14  ;;  %v2076_v14 = vor.u32 %v2209_v8, %v2075_v24  ;;  %v3125_v21 = vor.u32 1.1754944e-38, %v882_v54  ;;  %v2011_v54 = vld [vmem:[#allocation12 + $0x158] sm:$0xf] }
 0x1c9   :  { %v3098_v29 = vadd.f32 1.0, %v2245_v23  ;;  %1351 = vmatpush.bf16.msrb.mxu3 %v1864_v17  ;;  %1365 = vmatpush.bf16.msra.mxu0 %v1868_v39  ;;  %v2200_v23 = vld [vmem:[#allocation12 + $0x1ac] sm:$0xf0]  ;;  %v2201_v39 = vld [vmem:[#allocation12 + $0x1b4] sm:$0xf0]  ;;  %vm3166_vm7 = vcmp.eq.f32.partialorder %v880_v5, 8.507059e+37  ;;  %v2012_v1 = vor.u32 %v2193_v58, %v2011_v54 }
 0x1ca   :  { %2250 = vpow2.f32 %v1818_v25  ;;  %v2196_v25 = vld [vmem:[#allocation12 + $0x194] sm:$0xf]  ;;  %v2036_v17 = vor.u32 %v2200_v23, %v2035_v18  ;;  %v2044_v43 = vor.u32 %v2201_v39, %v2043_v34  ;;  %v2185_v18 = vld [vmem:[#allocation12 + $0x134] sm:$0xf0] }
 0x1cb   :  { %v2247_v35 = vpop.eup %2246  ;;  %2252 = vrcp.f32 %v3098_v29  ;;  %v840_v46 = vand.u32 2147483647, %v3098_v29  ;;  %v842_v55 = vand.u32 2147483648, %v3098_v29  ;;  %1379 = vmatpush.bf16.msra.mxu1 %v1872_v47  ;;  %vm836_vm3 = vweird.f32 %v3098_v29  ;;  %v2172_v27 = vld [vmem:[#allocation12 + $0xd4] sm:$0xf] }
 0x1cc   :  { %v3101_v37 = vpop.eup %2248  ;;  %v3103_v38 = vadd.f32 1.0, %v2247_v35  ;;  %1388 = vmatpush.bf16.msra.mxu2 %v2036_v17  ;;  %v1947_v35 = vld [vmem:[#allocation12 + $0xd8] sm:$0xf] }
 0x1cd   :  { %v872_v42 = vmul.f32 %v3101_v37, %v3092_v4  ;;  %1352 = vmatpush.bf16.msrb.mxu3 %v1832_v50  ;;  %1366 = vmatpush.bf16.msra.mxu0 %v1836_v56  ;;  %vm877_vm1 = vweird.f32 %v3101_v37  ;;  %vm3138_vm5 = vcmp.eq.f32.partialorder %v840_v46, 8.507059e+37  ;;  %v843_v32 = vor.u32 1.1754944e-38, %v842_v55  ;;  %v2192_v46 = vld [vmem:[#allocation12 + $0x16c] sm:$0xf0]  ;;  %v2177_v17 = vld [vmem:[#allocation12 + $0xf4] sm:$0xf0] }
 0x1ce   :  { %2254 = vrcp.f32 %v3103_v38  ;;  %vm3133_vm4 = vmor %vm876_vm0, %vm877_vm1  ;;  %v2048_v50 = vor.u32 %v2197_v40, %v2045_v44  ;;  %v2004_v51 = vor.u32 %v2192_v46, %v2003_v45  ;;  %vm891_vm9 = vweird.f32 %v3103_v38  ;;  %v2173_v44 = vld [vmem:[#allocation12 + $0xdc] sm:$0xf]  ;;  %v1915_v54 = vld [vmem:[#allocation12 + $0x98] sm:$0xf] }
 0x1cf   :  { %v873_v59 = vsub.f32 1.0, %v872_v42  ;;  %1380 = vmatpush.bf16.msra.mxu1 %v1840_v62  ;;  %v2040_v42 = vor.u32 %v2196_v25, %v2037_v33  ;;  %v2013_v62 = vld [vmem:[#allocation12 + $0x178] sm:$0xf0]  ;;  %v818_v33 = vpop.f32.mrf.mxu1 }
 0x1d0   :  { %v2251_v53 = vpop.eup %2250  ;;  %1389 = vmatpush.bf16.msra.mxu2 %v2004_v51  ;;  %v1949_v45 = vld [vmem:[#allocation12 + $0xf8] sm:$0xf0] }
 0x1d1   :  { %v3111_v15 = vpop.eup %2252  ;;  %v3113_v61 = vadd.f32 1.0, %v2251_v53  ;;  %v874_v19 = vmul.f32 %v3101_v37, %v873_v59  ;;  %1401 = vmatpush.bf16.msra.mxu3 %v2072_v12  ;;  %1415 = vmatpush.bf16.msrb.mxu0 %v2076_v14  ;;  %v2005_v53 = vld [vmem:[#allocation12 + $0x170] sm:$0xf0]  ;;  %v2189_v59 = vld [vmem:[#allocation12 + $0x15c] sm:$0xf]  ;;  %v1952_v58 = vor.u32 %v2173_v44, %v1949_v45 }
 0x1d2   :  { %v832_v0 = vmul.f32 %v3111_v15, %v3098_v29  ;;  %vm837_vm2 = vweird.f32 %v3111_v15  ;;  %v817_v29 = vadd.f32 %v816_v28, %v647_v13  ;;  %v2008_v57 = vor.u32 %v2188_v52, %v2005_v53  ;;  %v1973_v12 = vld [vmem:[#allocation12 + $0x130] sm:$0xf0]  ;;  %v1981_v28 = vld [vmem:[#allocation12 + $0x138] sm:$0xf0] }
 0x1d3   :  { %2256 = vrcp.f32 %v3113_v61  ;;  %vm3148_vm6 = vmor %vm836_vm3, %vm837_vm2  ;;  %v855_v36 = vand.u32 2147483647, %v3113_v61  ;;  %1429 = vmatpush.bf16.msrb.mxu1 %v2080_v22  ;;  %v875_v49 = vadd.f32 %v3101_v37, %v874_v19  ;;  %v857_v8 = vand.u32 2147483648, %v3113_v61  ;;  %v2181_v19 = vld [vmem:[#allocation12 + $0x11c] sm:$0xf] }
 0x1d4   :  { %v3121_v10 = vpop.eup %2254  ;;  %v833_v11 = vsub.f32 1.0, %v832_v0  ;;  %v2016_v9 = vor.u32 %v2189_v59, %v2013_v62  ;;  %v1941_v22 = vld [vmem:[#allocation12 + $0xf0] sm:$0xf0]  ;;  %vm851_vm10 = vweird.f32 %v3113_v61  ;;  %v2165_v62 = vld [vmem:[#allocation12 + $0x9c] sm:$0xf] }
 0x1d5   :  { %v887_v4 = vmul.f32 %v3121_v10, %v3103_v38  ;;  %1402 = vmatpush.bf16.msra.mxu3 %v2040_v42  ;;  %1416 = vmatpush.bf16.msrb.mxu0 %v2044_v43  ;;  %v879_v14 = vsel %vm3133_vm4, %v3101_v37, %v875_v49  ;;  %v1980_v37 = vor.u32 %v2185_v18, %v1979_v16  ;;  %vm3192_vm12 = vcmp.eq.f32.partialorder %v855_v36, 8.507059e+37  ;;  %v2168_v36 = vld [vmem:[#allocation12 + $0xac] sm:$0xf0]  ;;  %v2164_v49 = vld [vmem:[#allocation12 + $0x94] sm:$0xf] }
 0x1d6   :  { %v834_v30 = vmul.f32 %v3111_v15, %v833_v11  ;;  %v2180_v11 = vld [vmem:[#allocation12 + $0x114] sm:$0xf]  ;;  %v884_v39 = vsel %vm3166_vm7, %v3125_v21, %v879_v14  ;;  %v858_v42 = vor.u32 1.1754944e-38, %v857_v8  ;;  %vm892_vm13 = vweird.f32 %v3121_v10 }
 0x1d7   :  { %v888_v63 = vsub.f32 1.0, %v887_v4  ;;  %1430 = vmatpush.bf16.msrb.mxu1 %v2048_v50  ;;  %v1984_v4 = vor.u32 %v2181_v19, %v1981_v28  ;;  %v1944_v46 = vor.u32 %v2172_v27, %v1941_v22  ;;  %v819_v50 = vadd.f32 %v818_v33, %v647_v13  ;;  %v1909_v53 = vld [vmem:[#allocation12 + $0xb0] sm:$0xf0]  ;;  %vm3212_vm14 = vmor %vm891_vm9, %vm892_vm13  ;;  %v2157_v19 = vld [vmem:[#allocation12 + $0x5c] sm:$0xf] }
 0x1d8   :  { %v835_v41 = vadd.f32 %v3111_v15, %v834_v30  ;;  %v1939_v30 = vld [vmem:[#allocation12 + $0xd0] sm:$0xf]  ;;  %v907_v13 = vsub.f32 1.0, %v884_v39 }
 0x1d9   :  { %v3154_v47 = vpop.eup %2256  ;;  %1403 = vmatpush.bf16.msra.mxu3 %v2008_v57  ;;  %1417 = vmatpush.bf16.msrb.mxu0 %v2012_v1  ;;  %v1940_v43 = vor.u32 %v2176_v31, %v1939_v30  ;;  %v1843_v28 = vld [vmem:[#allocation12 + $0x10] sm:$0xf]  ;;  %v2148_v30 = vld [vmem:[#allocation12 + $0x14] sm:$0xf] }
 0x1da   :  { %v839_v55 = vsel %vm3148_vm6, %v3111_v15, %v835_v41  ;;  %v847_v56 = vmul.f32 %v3154_v47, %v3113_v61  ;;  %v2184_v15 = vld [vmem:[#allocation12 + $0x12c] sm:$0xf0]  ;;  %vm852_vm8 = vweird.f32 %v3154_v47  ;;  %v1845_v31 = vld [vmem:[#allocation12 + $0x30] sm:$0xf0] }
 0x1db   :  { %v844_v60 = vsel %vm3138_vm5, %v843_v32, %v839_v55  ;;  %v1972_v5 = vor.u32 %v2184_v15, %v1971_v2  ;;  %v889_v32 = vmul.f32 %v3121_v10, %v888_v63  ;;  %1431 = vmatpush.bf16.msrb.mxu1 %v2016_v9  ;;  %vm3186_vm11 = vmor %vm851_vm10, %vm852_vm8  ;;  %v1907_v61 = vld [vmem:[#allocation12 + $0x90] sm:$0xf]  ;;  %v2169_v55 = vld [vmem:[#allocation12 + $0xb4] sm:$0xf0] }
 0x1dc   :  { %v901_v3 = vmul.f32 %v844_v60, %v3072_v20  ;;  %v848_v24 = vsub.f32 1.0, %v847_v56  ;;  %v1976_v20 = vor.u32 %v2180_v11, %v1973_v12  ;;  %v895_v56 = vand.u32 2147483647, %v3103_v38  ;;  %v1917_v63 = vld [vmem:[#allocation12 + $0xb8] sm:$0xf0] }
 0x1dd   :  { %1390 = vmatpush.bf16.msra.mxu2 %v1972_v5  ;;  %1418 = vmatpush.bf16.msrb.mxu0 %v1980_v37  ;;  %v890_v52 = vadd.f32 %v3121_v10, %v889_v32  ;;  %v1908_v59 = vor.u32 %v2168_v36, %v1907_v61  ;;  %v1916_v1 = vor.u32 %v2169_v55, %v1915_v54  ;;  %v1875_v2 = vld [vmem:[#allocation12 + $0x50] sm:$0xf]  ;;  %v1877_v9 = vld [vmem:[#allocation12 + $0x70] sm:$0xf0]  ;;  %v1883_v11 = vld [vmem:[#allocation12 + $0x58] sm:$0xf] }
 0x1de   :  { %v903_v23 = vadd.f32 %v901_v3, %v817_v29  ;;  %v849_v25 = vmul.f32 %v3154_v47, %v848_v24  ;;  %1404 = vmatpush.bf16.msra.mxu3 %v1976_v20  ;;  %v1948_v29 = vor.u32 %v2177_v17, %v1947_v35  ;;  %v2160_v15 = vld [vmem:[#allocation12 + $0x6c] sm:$0xf0]  ;;  %v2156_v3 = vld [vmem:[#allocation12 + $0x54] sm:$0xf]  ;;  %v2161_v12 = vld [vmem:[#allocation12 + $0x74] sm:$0xf0]  ;;  %v1920_v5 = vor.u32 %v2165_v62, %v1917_v63 }
 0x1df   :  { %1432 = vmatpush.bf16.msrb.mxu1 %v1984_v4  ;;  %v894_v8 = vsel %vm3212_vm14, %v3121_v10, %v890_v52  ;;  %vm896_vm15 = vcmp.eq.f32.partialorder %v895_v56, 8.507059e+37  ;;  %v1876_v18 = vor.u32 %v2160_v15, %v1875_v2  ;;  %v1884_v20 = vor.u32 %v2161_v12, %v1883_v11  ;;  %v2152_v10 = vld [vmem:[#allocation12 + $0x2c] sm:$0xf0]  ;;  %v1851_v32 = vld [vmem:[#allocation12 + $0x18] sm:$0xf] }
 0x1e0   :  { %2258 = vtanh.f32 %v903_v23  ;;  %v850_v34 = vadd.f32 %v3154_v47, %v849_v25  ;;  %v1885_v23 = vld [vmem:[#allocation12 + $0x78] sm:$0xf0]  ;;  %v2153_v37 = vld [vmem:[#allocation12 + $0x34] sm:$0xf0]  ;;  %v1844_v33 = vor.u32 %v2152_v10, %v1843_v28  ;;  %v1848_v17 = vor.u32 %v2148_v30, %v1845_v31 }
 0x1e1   :  { %1391 = vmatpush.bf16.msra.mxu2 %v1940_v43  ;;  %1419 = vmatpush.bf16.msrb.mxu0 %v1948_v29  ;;  %v1888_v27 = vor.u32 %v2157_v19, %v1885_v23  ;;  %v1853_v4 = vld [vmem:[#allocation12 + $0x38] sm:$0xf0] }
 0x1e2   :  { %v854_v21 = vsel %vm3186_vm11, %v3154_v47, %v850_v34  ;;  %v897_v47 = vand.u32 2147483648, %v3103_v38  ;;  %1405 = vmatpush.bf16.msra.mxu3 %v1944_v46  ;;  %v911_v38 = vmul.f32 %v884_v39, %v2913_v6  ;;  %v1880_v6 = vor.u32 %v2156_v3, %v1877_v9  ;;  %v2149_v34 = vld [vmem:[#allocation12 + $0x1c] sm:$0xf] }
 0x1e3   :  { %v859_v51 = vsel %vm3192_vm12, %v858_v42, %v854_v21  ;;  %1433 = vmatpush.bf16.msrb.mxu1 %v1952_v58  ;;  %v1852_v39 = vor.u32 %v2153_v37, %v1851_v32  ;;  %v1856_v42 = vor.u32 %v2149_v34, %v1853_v4 }
 0x1e4   :  { %v902_v57 = vmul.f32 %v859_v51, %v3078_v26  ;;  %v1912_v26 = vor.u32 %v2164_v49, %v1909_v53  ;;  %v898_v14 = vor.u32 1.1754944e-38, %v897_v47 }
 0x1e5   :  { %1392 = vmatpush.bf16.msra.mxu2 %v1908_v59  ;;  %1420 = vmatpush.bf16.msrb.mxu0 %v1916_v1 }
 0x1e6   :  { %v2259_v60 = vpop.eup %2258  ;;  %v904_v0 = vadd.f32 %v902_v57, %v819_v50  ;;  %v899_v25 = vsel %vm896_vm15, %v898_v14, %v894_v8  ;;  %1406 = vmatpush.bf16.msra.mxu3 %v1912_v26 }
 0x1e7   :  { %v909_v24 = vmul.f32 %v2259_v60, %v907_v13  ;;  %1434 = vmatpush.bf16.msrb.mxu1 %v1920_v5  ;;  %v908_v22 = vsub.f32 1.0, %v899_v25  ;;  %v912_v41 = vmul.f32 %v899_v25, %v2918_v7  ;;  %v987_v7 = vld [vmem:[%s3241_s8] sm:$0xff]  ;;  %s2818_s8 = smov [#allocation13]  }
 0x1e8   :  { %2260 = vtanh.f32 %v904_v0  ;;  %v991_v21 = vperm.slane %v987_v7, 2  ;;  %v992_v46 = vperm.slane %v987_v7, 3  ;;  %v989_v50 = vperm.slane %v987_v7, 0 }
 0x1e9   :  { %v913_v16 = vadd.f32 %v911_v38, %v909_v24  ;;  %1393 = vmatpush.bf16.msra.mxu2 %v1876_v18  ;;  %1421 = vmatpush.bf16.msrb.mxu0 %v1884_v20  ;;  %v990_v51 = vperm.slane %v987_v7, 1  ;;  %v995_v59 = vperm.slane %v987_v7, 6  ;;  %v996_v62 = vperm.slane %v987_v7, 7 }
 0x1ea   :  { %1407 = vmatpush.bf16.msra.mxu3 %v1880_v6  ;;  %v993_v15 = vperm.slane %v987_v7, 4  ;;  %v994_v3 = vperm.slane %v987_v7, 5 }
 0x1eb   :  { %915 = vst [vmem:[%s3243_s10] sm:$0xff] %v913_v16  ;;  %1435 = vmatpush.bf16.msrb.mxu1 %v1888_v27 }
 0x1ed   :  { %1394 = vmatpush.bf16.msra.mxu2 %v1844_v33  ;;  %1422 = vmatpush.bf16.msrb.mxu0 %v1852_v39 }
 0x1ee   :  { %v2261_v35 = vpop.eup %2260  ;;  %1408 = vmatpush.bf16.msra.mxu3 %v1848_v17 }
 0x1ef   :  { %v910_v40 = vmul.f32 %v2261_v35, %v908_v22  ;;  %1436 = vmatpush.bf16.msrb.mxu1 %v1856_v42 }
 0x1f1   :  { %v914_v43 = vadd.f32 %v912_v41, %v910_v40 }
 0x1f3   :  { %916 = vst [vmem:[%s3243_s10 + $0x8] sm:$0xff] %v914_v43  ;;  %v2213_v44 = vpack.c.bf16 %v914_v43, %v913_v16  ;;  %s1463_s10 = sshll.u32 %s2818_s8, 4  ;;  %s1464_s10 = int_to_ptr.vmem [resolvable:$true] %s1463_s10 }
 0x1f5   :  { %2214 = vst [vmem:[#allocation3] sm:$0xff] %v2213_v44  }
 0x1fc   :  { %v2145_v45 = vld [vmem:[#allocation3] sm:$0xff] }
 0x1fd   :  { %1339 = vmatmul.bf16.vlgmr.msrb.gmra.mxu2 %v2145_v45  ;;  %1353 = vmatmul.bf16.vlgmr.msrb.gmra.mxu3 %v2145_v45 }
 0x1fe   :  { %1367 = vmatmul.bf16.vlgmr.msra.gmra.mxu0 %v2145_v45  ;;  %1381 = vmatmul.bf16.vlgmr.msra.gmra.mxu1 %v2145_v45 }
 0x20d   :  { %1395 = vmatmul.bf16.vlgmr.msra.gmra.mxu2 %v2145_v45  ;;  %1409 = vmatmul.bf16.vlgmr.msra.gmra.mxu3 %v2145_v45 }
 0x20e   :  { %1423 = vmatmul.bf16.vlgmr.msrb.gmra.mxu0 %v2145_v45  ;;  %1437 = vmatmul.bf16.vlgmr.msrb.gmra.mxu1 %v2145_v45 }
 0x27b   :  { %v1368_v29 = vpop.f32.mrf.mxu0  ;;  %v1382_v61 = vpop.f32.mrf.mxu1 }
 0x27c   :  { %v1369_v36 = vadd.f32 %v1368_v29, %v991_v21  ;;  %v1383_v49 = vadd.f32 %v1382_v61, %v992_v46 }
 0x27e   :  { %1445 = vst [vmem:[#allocation13 + $0x10] sm:$0xff] %v1369_v36 }
 0x27f   :  { %1446 = vst [vmem:[#allocation13 + $0x18] sm:$0xff] %v1383_v49 }
 0x280   :  { %v1340_v52 = vpop.f32.mrf.mxu2  ;;  %v1354_v53 = vpop.f32.mrf.mxu3 }
 0x281   :  { %v1341_v54 = vadd.f32 %v1340_v52, %v989_v50  ;;  %v1355_v55 = vadd.f32 %v1354_v53, %v990_v51 }
 0x283   :  { %1443 = vst [vmem:[#allocation13] sm:$0xff] %v1341_v54  ;;  %v1370_v47 = vpop.f32.mrf.mxu0  ;;  %v1384_v56 = vpop.f32.mrf.mxu1 }
 0x284   :  { %1444 = vst [vmem:[#allocation13 + $0x8] sm:$0xff] %v1355_v55  ;;  %v1371_v57 = vadd.f32 %v1370_v47, %v991_v21  ;;  %v1385_v58 = vadd.f32 %v1384_v56, %v992_v46 }
 0x286   :  { %1453 = vst [vmem:[#allocation13 + $0x50] sm:$0xff] %v1371_v57 }
 0x287   :  { %1454 = vst [vmem:[#allocation13 + $0x58] sm:$0xff] %v1385_v58 }
 0x288   :  { %v1342_v48 = vpop.f32.mrf.mxu2  ;;  %v1356_v13 = vpop.f32.mrf.mxu3 }
 0x289   :  { %v1343_v63 = vadd.f32 %v1342_v48, %v989_v50  ;;  %v1357_v60 = vadd.f32 %v1356_v13, %v990_v51 }
 0x28b   :  { %1451 = vst [vmem:[#allocation13 + $0x40] sm:$0xff] %v1343_v63  ;;  %v1424_v0 = vpop.f32.mrf.mxu0  ;;  %v1438_v26 = vpop.f32.mrf.mxu1 }
 0x28c   :  { %1452 = vst [vmem:[#allocation13 + $0x48] sm:$0xff] %v1357_v60  ;;  %v1425_v1 = vadd.f32 %v1424_v0, %v995_v59  ;;  %v1439_v2 = vadd.f32 %v1438_v26, %v996_v62 }
 0x28e   :  { %1449 = vst [vmem:[#allocation13 + $0x30] sm:$0xff] %v1425_v1 }
 0x28f   :  { %1450 = vst [vmem:[#allocation13 + $0x38] sm:$0xff] %v1439_v2 }
 0x290   :  { %v1396_v24 = vpop.f32.mrf.mxu2  ;;  %v1410_v38 = vpop.f32.mrf.mxu3 }
 0x291   :  { %v1397_v8 = vadd.f32 %v1396_v24, %v993_v15  ;;  %v1411_v9 = vadd.f32 %v1410_v38, %v994_v3 }
 0x293   :  { %1447 = vst [vmem:[#allocation13 + $0x20] sm:$0xff] %v1397_v8  ;;  %v1426_v11 = vpop.f32.mrf.mxu0  ;;  %v1440_v12 = vpop.f32.mrf.mxu1 }
 0x294   :  { %1448 = vst [vmem:[#allocation13 + $0x28] sm:$0xff] %v1411_v9  ;;  %v1427_v14 = vadd.f32 %v1426_v11, %v995_v59  ;;  %v1441_v5 = vadd.f32 %v1440_v12, %v996_v62 }
 0x296   :  { %1457 = vst [vmem:[#allocation13 + $0x70] sm:$0xff] %v1427_v14 }
 0x297   :  { %1458 = vst [vmem:[#allocation13 + $0x78] sm:$0xff] %v1441_v5 }
 0x298   :  { %v1398_v16 = vpop.f32.mrf.mxu2  ;;  %v1412_v18 = vpop.f32.mrf.mxu3 }
 0x299   :  { %v1399_v19 = vadd.f32 %v1398_v16, %v993_v15  ;;  %v1413_v23 = vadd.f32 %v1412_v18, %v994_v3 }
 0x29b   :  { %1455 = vst [vmem:[#allocation13 + $0x60] sm:$0xff] %v1399_v19 }
 0x29c   :  { %1456 = vst [vmem:[#allocation13 + $0x68] sm:$0xff] %v1413_v23 }
 0x29d   :  { %1471 = dma.vmem_to_hbm [thread:$0]  %s1464_s10, 2048, %s1466_s19, [#allocation9], %s2819_s20, %s2819_s20, %s2820_s3  }
 0x29e   :  { %2792 = dma.done.wait [#allocation9], 2048  }
 0x29f   :  { %2793 = vsyncadd [#allocation9], 4294965248 }
 0x2a0   :  { %1480 = vsyncpa [#allocation8], 1 }
 0x2a1   :  { %1481 = vsyncpa [#allocation11], 1 }
 0x2a2   :  { %1482 = vsyncpa [#allocation9], 1 }
 0x2a3   :  { %1483 = vsyncmov [#allocation4] }
 0x2a6   :  { %s1484_s2 = vpop.sfrf %1483 }
 0x2a7   :  { %p2081_p10 = scmp.ne.s32.totalorder %s1484_s2, 0 }
 0x2a9   :  { %1488 = shalt.err (%p2081_p10)  }
 0x2aa   :  { %1490 = vsyncmov [#allocation4 + $0x1] }
 0x2ad   :  { %s1491_s9 = vpop.sfrf %1490 }
 0x2ae   :  { %p2082_p11 = scmp.ne.s32.totalorder %s1491_s9, 0 }
 0x2b0   :  { %1495 = shalt.err (%p2082_p11)  }
 0x2b1   :  { %1497 = vsyncmov [#allocation4 + $0x2] }
 0x2b4   :  { %s1498_s27 = vpop.sfrf %1497 }
 0x2b5   :  { %p2083_p12 = scmp.ne.s32.totalorder %s1498_s27, 0 }
 0x2b7   :  { %1502 = shalt.err (%p2083_p12)  }
 0x2b8   :  { %1504 = vsyncmov [#allocation4 + $0x3] }
 0x2bb   :  { %s1505_s21 = vpop.sfrf %1504 }
 0x2bc   :  { %p2084_p13 = scmp.ne.s32.totalorder %s1505_s21, 0 }
 0x2be   :  { %1509 = shalt.err (%p2084_p13)  }
 0x2bf   :  { %1511 = vsyncmov [#allocation4 + $0x4] }
 0x2c2   :  { %s1512_s16 = vpop.sfrf %1511 }
 0x2c3   :  { %p2085_p0 = scmp.ne.s32.totalorder %s1512_s16, 0 }
 0x2c5   :  { %1516 = shalt.err (%p2085_p0)  }
 0x2c6   :  { %1518 = vsyncmov [#allocation4 + $0x5] }
 0x2c9   :  { %s1519_s22 = vpop.sfrf %1518 }
 0x2ca   :  { %p2086_p1 = scmp.ne.s32.totalorder %s1519_s22, 0 }
 0x2cc   :  { %1523 = shalt.err (%p2086_p1)  }
 0x2cd   :  { %1525 = vsyncmov [#allocation4 + $0x6] }
 0x2d0   :  { %s1526_s0 = vpop.sfrf %1525 }
 0x2d1   :  { %p2087_p2 = scmp.ne.s32.totalorder %s1526_s0, 0 }
 0x2d3   :  { %1530 = shalt.err (%p2087_p2)  }
 0x2d4   :  { %1532 = vsyncmov [#allocation4 + $0x7] }
 0x2d7   :  { %s1533_s24 = vpop.sfrf %1532 }
 0x2d8   :  { %p2088_p3 = scmp.ne.s32.totalorder %s1533_s24, 0 }
 0x2da   :  { %1537 = shalt.err (%p2088_p3)  }
 0x2db   :  { %1539 = vsyncmov [#allocation4 + $0x8] }
 0x2de   :  { %s1540_s25 = vpop.sfrf %1539 }
 0x2df   :  { %p2089_p4 = scmp.ne.s32.totalorder %s1540_s25, 0 }
 0x2e1   :  { %1544 = shalt.err (%p2089_p4)  }
 0x2e2   :  { %1546 = vsyncmov [#allocation4 + $0x9] }
 0x2e5   :  { %s1547_s29 = vpop.sfrf %1546 }
 0x2e6   :  { %p2090_p5 = scmp.ne.s32.totalorder %s1547_s29, 0 }
 0x2e8   :  { %1551 = shalt.err (%p2090_p5)  }
 0x2e9   :  { %1553 = vsyncmov [#allocation4 + $0xa] }
 0x2ec   :  { %s1554_s11 = vpop.sfrf %1553 }
 0x2ed   :  { %p2091_p6 = scmp.ne.s32.totalorder %s1554_s11, 0 }
 0x2ef   :  { %1558 = shalt.err (%p2091_p6)  }
 0x2f0   :  { %1560 = vsyncmov [#allocation4 + $0xb] }
 0x2f3   :  { %s1561_s14 = vpop.sfrf %1560 }
 0x2f4   :  { %p2092_p7 = scmp.ne.s32.totalorder %s1561_s14, 0 }
 0x2f6   :  { %1565 = shalt.err (%p2092_p7)  }
 0x2f7   :  { %1567 = vsyncmov [#allocation4 + $0xc] }
 0x2fa   :  { %s1568_s28 = vpop.sfrf %1567 }
 0x2fb   :  { %p2093_p8 = scmp.ne.s32.totalorder %s1568_s28, 0 }
 0x2fd   :  { %1572 = shalt.err (%p2093_p8)  }
 0x2fe   :  { %1574 = vsyncmov [#allocation4 + $0xd] }
 0x301   :  { %s1575_s4 = vpop.sfrf %1574 }
 0x302   :  { %p2094_p9 = scmp.ne.s32.totalorder %s1575_s4, 0 }
 0x304   :  { %1579 = shalt.err (%p2094_p9)  }
 0x305   :  { %1581 = vsyncmov [#allocation4 + $0xe] }
 0x308   :  { %s1582_s7 = vpop.sfrf %1581 }
 0x309   :  { %p2095_p10 = scmp.ne.s32.totalorder %s1582_s7, 0 }
 0x30b   :  { %1586 = shalt.err (%p2095_p10)  }
 0x30c   :  { %1588 = vsyncmov [#allocation4 + $0xf] }
 0x30f   :  { %s1589_s30 = vpop.sfrf %1588 }
 0x310   :  { %p2096_p11 = scmp.ne.s32.totalorder %s1589_s30, 0 }
 0x312   :  { %1593 = shalt.err (%p2096_p11)  }

</bundles_post_ra>
